<compile_context>
chip_gen: v7x
topology: tpu7x:2x2x1
jax: 0.10.0
libtpu: 0.0.40
codegen_flags: <defaults>
</compile_context>

<pallas_src>
import functools

import jax
import jax.numpy as jnp
import numpy as np
from jax.experimental import pallas as pl
from jax.experimental.pallas import tpu as pltpu

# Flip on for v6e/v7x: casts MXU operands (taps + weights) to bf16 while keeping
# f32 accumulation (preferred_element_type) and f32 elementwise math / scratch.
USE_BF16_MXU = False


# ----------------------------------------------------------------------------
# Fused head kernel (runs once per batch element)
# ----------------------------------------------------------------------------
def _fused_head_kernel(*refs, num_convs, H, W, lane_m, use_bf16):
    """refs = [x, interior_mask, (w_i, b_i)*num_convs, w_last, b_last, out, act?]

    Layout: channels on sublanes, padded-flattened HW on lanes.
      x_ref    : (Cin,    Lscratch)  zero-padded image at lanes [lane_m, lane_m+Lp)
      w_i      : (9, Cinner, Cin_i)  per-tap (Cout, Cin) matrices, tap-major
      b_i      : (Cinner, 1)
      w_last   : (cout, Cinner), b_last: (cout, 1)
      out      : (cout, Lp)          padded-flat NCHW (wrapper strips the halo)
      act_ref  : (Cinner, Lscratch)  VMEM scratch holding the haloed activation
    """
    Wp = W + 2
    Lp = (H + 2) * Wp

    x_ref, mask_ref = refs[0], refs[1]
    ws = [refs[2 + 2 * i] for i in range(num_convs)]
    bs = [refs[3 + 2 * i] for i in range(num_convs)]
    w_last_ref = refs[2 + 2 * num_convs]
    b_last_ref = refs[3 + 2 * num_convs]
    o_ref = refs[4 + 2 * num_convs]
    act_ref = refs[5 + 2 * num_convs] if num_convs >= 2 else None

    def conv3x3(src_ref, w_ref, b_ref, apply_mask):
        """3x3 'same' conv + bias + ReLU over the whole padded grid.

        9 accumulated dots (no tap concatenation); taps are static lane slices
        of the zero-haloed source, so boundary pixels read zeros (2-D halo),
        no per-tap selects.
        """
        cout = w_ref.shape[1]
        acc = jnp.zeros((cout, Lp), jnp.float32)
        t = 0
        for oh in (-1, 0, 1):
            for ow in (-1, 0, 1):
                s = oh * Wp + ow
                tap = src_ref[:, lane_m + s:lane_m + s + Lp]   # (Cin, Lp)
                wt = w_ref[t]                                  # (Cout, Cin)
                if use_bf16:
                    tap = tap.astype(jnp.bfloat16)
                    wt = wt.astype(jnp.bfloat16)
                acc = acc + jnp.dot(wt, tap,
                                    preferred_element_type=jnp.float32)
                t += 1
        y = jnp.maximum(acc + b_ref[...], 0.0)                 # (Cout, Lp)
        if apply_mask:
            # Re-zero the halo ring so the NEXT conv's taps read true zeros.
            y = y * mask_ref[...]
        return y

    if act_ref is not None:
        # Zero only the DMA margins once; halo columns inside [lane_m, lane_m+Lp)
        # are maintained by the interior-mask multiply on each stored layer.
        cin_s, ls = act_ref.shape
        act_ref[:, :lane_m] = jnp.zeros((cin_s, lane_m), act_ref.dtype)
        act_ref[:, lane_m + Lp:] = jnp.zeros((cin_s, ls - lane_m - Lp),
                                             act_ref.dtype)

    # ---- layer 0: reads the zero-padded input block directly (no im2col) ----
    y = conv3x3(x_ref, ws[0], bs[0], apply_mask=(num_convs >= 2))

    # ---- layers 1..num_convs-1: activation stays resident in VMEM scratch ----
    for i in range(1, num_convs):
        act_ref[:, lane_m:lane_m + Lp] = y
        y = conv3x3(act_ref, ws[i], bs[i], apply_mask=(i < num_convs - 1))

    # ---- final 1x1 conv: (cout, Cinner) @ (Cinner, Lp) -> lane-dense store ----
    wl = w_last_ref[...]
    if use_bf16:
        wl = wl.astype(jnp.bfloat16)
        y = y.astype(jnp.bfloat16)
    out = jnp.dot(wl, y, preferred_element_type=jnp.float32) + b_last_ref[...]
    o_ref[...] = out.astype(o_ref.dtype)


# ----------------------------------------------------------------------------
# Wrapper: minimal layout glue (spatial zero-pad + weight re-layout)
# ----------------------------------------------------------------------------
def single_head_forward(params, x_nchw):
    """Input/output in NCHW, matching the PyTorch module exactly."""
    B, Cin, H, W = x_nchw.shape
    num_convs = len(params) - 1
    assert num_convs >= 1
    Hp, Wp = H + 2, W + 2
    Lp = Hp * Wp
    cinner = params[0][0].shape[-1]
    cout = params[-1][0].shape[-1]

    # Lane geometry: image lives at lanes [lane_m, lane_m + Lp); margins of at
    # least Wp+1 lanes on each side absorb the largest tap shift.
    lane_m = 128
    l_scratch = ((lane_m + Lp + (Wp + 1) + 127) // 128) * 128

    # Spatial zero-pad (2-D halo) + DMA margins; ~1.3x input bytes (vs 9x im2col).
    x_pad = jnp.pad(x_nchw, ((0, 0), (0, 0), (1, 1), (1, 1))).reshape(B, Cin, Lp)
    x_in = jnp.pad(x_pad, ((0, 0), (0, 0), (lane_m, l_scratch - lane_m - Lp)))

    # Static interior mask (1 at interior pixels, 0 on the halo ring).
    m2 = np.zeros((Hp, Wp), np.float32)
    m2[1:H + 1, 1:W + 1] = 1.0
    interior_mask = jnp.asarray(m2.reshape(1, Lp))

    inputs = [x_in, interior_mask]
    in_specs = [pl.BlockSpec((None, Cin, l_scratch), lambda b: (b, 0, 0)),
                pl.BlockSpec((1, Lp), lambda b: (0, 0))]
    for (w, bvec) in params[:-1]:
        kh, kw, ci, co = w.shape
        w9 = jnp.transpose(w.reshape(kh * kw, ci, co), (0, 2, 1))  # (9, Cout, Cin)
        inputs += [w9, bvec.reshape(co, 1)]
        in_specs += [pl.BlockSpec((kh * kw, co, ci), lambda b: (0, 0, 0)),
                     pl.BlockSpec((co, 1), lambda b: (0, 0))]
    w_last, b_last = params[-1]
    w_last2 = jnp.transpose(w_last.reshape(cinner, cout))          # (cout, Cinner)
    inputs += [w_last2, b_last.reshape(cout, 1)]
    in_specs += [pl.BlockSpec((cout, cinner), lambda b: (0, 0)),
                 pl.BlockSpec((cout, 1), lambda b: (0, 0))]

    scratch = []
    if num_convs >= 2:
        scratch.append(pltpu.VMEM((cinner, l_scratch), jnp.float32))

    out = pl.pallas_call(
        functools.partial(_fused_head_kernel, num_convs=num_convs,
                          H=H, W=W, lane_m=lane_m, use_bf16=USE_BF16_MXU),
        out_shape=jax.ShapeDtypeStruct((B, cout, Lp), x_nchw.dtype),
        grid=(B,),
        in_specs=in_specs,
        out_specs=pl.BlockSpec((None, cout, Lp), lambda b: (b, 0, 0)),
        scratch_shapes=scratch,
        compiler_params=pltpu.CompilerParams(
            dimension_semantics=("parallel",)),
    )(*inputs)

    # Strip the halo ring: (B, cout, Lp) is already channel-major (NCHW order).
    out = out.reshape(B, cout, Hp, Wp)[:, :, 1:H + 1, 1:W + 1]
    return out


# ----------------------------------------------------------------------------
# Parameter init (HWIO weights) + pure-JAX reference
# ----------------------------------------------------------------------------
def init_single_head_params(key, in_channel, inner_channel, out_channel,
                            num_convs, bias_fill=False, bias_value=0.0,
                            weight_std=0.01):
    params = []
    for i in range(num_convs):
        inc = in_channel if i == 0 else inner_channel
        key, wk = jax.random.split(key)
        w = weight_std * jax.random.normal(wk, (3, 3, inc, inner_channel),
                                           jnp.float32)
        params.append((w, jnp.zeros((inner_channel,), jnp.float32)))
    key, wk = jax.random.split(key)
    w = weight_std * jax.random.normal(wk, (1, 1, inner_channel, out_channel),
                                       jnp.float32)
    b = jnp.full((out_channel,), bias_value if bias_fill else 0.0, jnp.float32)
    params.append((w, b))
    return params


def single_head_reference(params, x_nchw):
    x = jnp.transpose(x_nchw, (0, 2, 3, 1))
    n = len(params)
    for i, (w, b) in enumerate(params):
        pad = (w.shape[0] - 1) // 2
        x = jax.lax.conv_general_dilated(
            x, w, (1, 1), [(pad, pad), (pad, pad)],
            dimension_numbers=("NHWC", "HWIO", "NHWC"),
            precision=jax.lax.Precision.HIGHEST) + b
        if i < n - 1:
            x = jnp.maximum(x, 0.0)
    return jnp.transpose(x, (0, 3, 1, 2))


if __name__ == "__main__":
    key = jax.random.PRNGKey(0)
    pkey, xkey = jax.random.split(key)

    # SingleHead(in=4, inner=32, out=8, num_convs=2) at small spatial size.
    B, Cin, H, W = 2, 4, 16, 16
    inner_channel, out_channel, num_convs = 32, 8, 2

    # weight_std=0.1 (vs the module's 0.01 init) only to make the numerical
    # check sensitive; forward semantics do not depend on the init scale.
    params = init_single_head_params(
        pkey, Cin, inner_channel, out_channel, num_convs,
        bias_fill=True, bias_value=-2.19, weight_std=0.1)

    x = jax.random.normal(xkey, (B, Cin, H, W), jnp.float32)

    fwd = jax.jit(single_head_forward)
    y = jax.block_until_ready(fwd(params, x))
    assert y.shape == (B, out_channel, H, W), y.shape

    y_ref = single_head_reference(params, x)
    # Tolerance accounts for default (non-HIGHEST) MXU precision in the kernel.
    np.testing.assert_allclose(np.asarray(y), np.asarray(y_ref),
                               atol=2e-3, rtol=2e-3)

    print("KERNEL_OK")
</pallas_src>

<mosaic_0001>
module attributes {stable_mosaic.version = 11 : i64} {
  func.func @_fused_head_kernel(%arg0: i32, %arg1: memref<1x4x512xf32, #tpu.memory_space<vmem>>, %arg2: memref<1x324xf32, #tpu.memory_space<vmem>>, %arg3: memref<9x32x4xf32, #tpu.memory_space<vmem>>, %arg4: memref<32x1xf32, #tpu.memory_space<vmem>>, %arg5: memref<9x32x32xf32, #tpu.memory_space<vmem>>, %arg6: memref<32x1xf32, #tpu.memory_space<vmem>>, %arg7: memref<8x32xf32, #tpu.memory_space<vmem>>, %arg8: memref<8x1xf32, #tpu.memory_space<vmem>>, %arg9: memref<1x8x324xf32, #tpu.memory_space<vmem>>, %arg10: memref<32x512xf32, #tpu.memory_space<vmem>>) attributes {dimension_semantics = [#tpu.dimension_semantics<parallel>], iteration_bounds = array<i64: 2>, scalar_prefetch = 0 : i64, scratch_operands = 1 : i64, tpu.core_type = #tpu.core_type<tc>, window_params = [{transform_indices = @transform_0, window_bounds = array<i64: 1, 4, 512>}, {pipeline_mode = #tpu.pipeline_mode<synchronous>, transform_indices = @transform_1, window_bounds = array<i64: 1, 324>}, {pipeline_mode = #tpu.pipeline_mode<synchronous>, transform_indices = @transform_2, window_bounds = array<i64: 9, 32, 4>}, {pipeline_mode = #tpu.pipeline_mode<synchronous>, transform_indices = @transform_3, window_bounds = array<i64: 32, 1>}, {pipeline_mode = #tpu.pipeline_mode<synchronous>, transform_indices = @transform_4, window_bounds = array<i64: 9, 32, 32>}, {pipeline_mode = #tpu.pipeline_mode<synchronous>, transform_indices = @transform_5, window_bounds = array<i64: 32, 1>}, {pipeline_mode = #tpu.pipeline_mode<synchronous>, transform_indices = @transform_6, window_bounds = array<i64: 8, 32>}, {pipeline_mode = #tpu.pipeline_mode<synchronous>, transform_indices = @transform_7, window_bounds = array<i64: 8, 1>}, {transform_indices = @transform_8, window_bounds = array<i64: 1, 8, 324>}]} {
    %cst = arith.constant 0.000000e+00 : f32
    %0 = vector.broadcast %cst : f32 to vector<32x128xf32>
    %c0 = arith.constant 0 : index
    %c0_0 = arith.constant 0 : index
    %1 = vector.load %arg10[%c0, %c0_0] : memref<32x512xf32, #tpu.memory_space<vmem>>, vector<32x128xf32>
    tpu.vector_store %arg10[%c0, %c0_0], %0 {strides = array<i32>} : memref<32x512xf32, #tpu.memory_space<vmem>>, vector<32x128xf32>,
    %cst_1 = arith.constant 0.000000e+00 : f32
    %2 = vector.broadcast %cst_1 : f32 to vector<32x60xf32>
    %c0_2 = arith.constant 0 : index
    %c452 = arith.constant 452 : index
    %3 = vector.load %arg10[%c0_2, %c452] : memref<32x512xf32, #tpu.memory_space<vmem>>, vector<32x60xf32>
    tpu.vector_store %arg10[%c0_2, %c452], %2 {strides = array<i32>} : memref<32x512xf32, #tpu.memory_space<vmem>>, vector<32x60xf32>,
    %cst_3 = arith.constant 0.000000e+00 : f32
    %4 = vector.broadcast %cst_3 : f32 to vector<32x324xf32>
    %c0_4 = arith.constant 0 : index
    %c0_5 = arith.constant 0 : index
    %c109 = arith.constant 109 : index
    %5 = vector.load %arg1[%c0_4, %c0_5, %c109] : memref<1x4x512xf32, #tpu.memory_space<vmem>>, vector<1x4x324xf32>
    %6 = vector.shape_cast %5 : vector<1x4x324xf32> to vector<4x324xf32>
    %c0_6 = arith.constant 0 : index
    %c0_7 = arith.constant 0 : index
    %c0_8 = arith.constant 0 : index
    %7 = vector.load %arg3[%c0_6, %c0_7, %c0_8] : memref<9x32x4xf32, #tpu.memory_space<vmem>>, vector<1x32x4xf32>
    %8 = vector.shape_cast %7 : vector<1x32x4xf32> to vector<32x4xf32>
    %cst_9 = arith.constant dense<0.000000e+00> : vector<32x324xf32>
    %9 = tpu.matmul %8, %6, %cst_9 {dimension_numbers = #tpu.dot_dimension_numbers<[1], [0], [0], [1], [0, 0, 1, 1], [], []>} : vector<32x4xf32>, vector<4x324xf32>, vector<32x324xf32> -> vector<32x324xf32>
    %10 = arith.addf %4, %9 : vector<32x324xf32>
    %c0_10 = arith.constant 0 : index
    %c0_11 = arith.constant 0 : index
    %c110 = arith.constant 110 : index
    %11 = vector.load %arg1[%c0_10, %c0_11, %c110] : memref<1x4x512xf32, #tpu.memory_space<vmem>>, vector<1x4x324xf32>
    %12 = vector.shape_cast %11 : vector<1x4x324xf32> to vector<4x324xf32>
    %c1 = arith.constant 1 : index
    %c0_12 = arith.constant 0 : index
    %c0_13 = arith.constant 0 : index
    %13 = vector.load %arg3[%c1, %c0_12, %c0_13] : memref<9x32x4xf32, #tpu.memory_space<vmem>>, vector<1x32x4xf32>
    %14 = vector.shape_cast %13 : vector<1x32x4xf32> to vector<32x4xf32>
    %cst_14 = arith.constant dense<0.000000e+00> : vector<32x324xf32>
    %15 = tpu.matmul %14, %12, %cst_14 {dimension_numbers = #tpu.dot_dimension_numbers<[1], [0], [0], [1], [0, 0, 1, 1], [], []>} : vector<32x4xf32>, vector<4x324xf32>, vector<32x324xf32> -> vector<32x324xf32>
    %16 = arith.addf %10, %15 : vector<32x324xf32>
    %c0_15 = arith.constant 0 : index
    %c0_16 = arith.constant 0 : index
    %c111 = arith.constant 111 : index
    %17 = vector.load %arg1[%c0_15, %c0_16, %c111] : memref<1x4x512xf32, #tpu.memory_space<vmem>>, vector<1x4x324xf32>
    %18 = vector.shape_cast %17 : vector<1x4x324xf32> to vector<4x324xf32>
    %c2 = arith.constant 2 : index
    %c0_17 = arith.constant 0 : index
    %c0_18 = arith.constant 0 : index
    %19 = vector.load %arg3[%c2, %c0_17, %c0_18] : memref<9x32x4xf32, #tpu.memory_space<vmem>>, vector<1x32x4xf32>
    %20 = vector.shape_cast %19 : vector<1x32x4xf32> to vector<32x4xf32>
    %cst_19 = arith.constant dense<0.000000e+00> : vector<32x324xf32>
    %21 = tpu.matmul %20, %18, %cst_19 {dimension_numbers = #tpu.dot_dimension_numbers<[1], [0], [0], [1], [0, 0, 1, 1], [], []>} : vector<32x4xf32>, vector<4x324xf32>, vector<32x324xf32> -> vector<32x324xf32>
    %22 = arith.addf %16, %21 : vector<32x324xf32>
    %c0_20 = arith.constant 0 : index
    %c0_21 = arith.constant 0 : index
    %c127 = arith.constant 127 : index
    %23 = vector.load %arg1[%c0_20, %c0_21, %c127] : memref<1x4x512xf32, #tpu.memory_space<vmem>>, vector<1x4x324xf32>
    %24 = vector.shape_cast %23 : vector<1x4x324xf32> to vector<4x324xf32>
    %c3 = arith.constant 3 : index
    %c0_22 = arith.constant 0 : index
    %c0_23 = arith.constant 0 : index
    %25 = vector.load %arg3[%c3, %c0_22, %c0_23] : memref<9x32x4xf32, #tpu.memory_space<vmem>>, vector<1x32x4xf32>
    %26 = vector.shape_cast %25 : vector<1x32x4xf32> to vector<32x4xf32>
    %cst_24 = arith.constant dense<0.000000e+00> : vector<32x324xf32>
    %27 = tpu.matmul %26, %24, %cst_24 {dimension_numbers = #tpu.dot_dimension_numbers<[1], [0], [0], [1], [0, 0, 1, 1], [], []>} : vector<32x4xf32>, vector<4x324xf32>, vector<32x324xf32> -> vector<32x324xf32>
    %28 = arith.addf %22, %27 : vector<32x324xf32>
    %c0_25 = arith.constant 0 : index
    %c0_26 = arith.constant 0 : index
    %c128 = arith.constant 128 : index
    %29 = vector.load %arg1[%c0_25, %c0_26, %c128] : memref<1x4x512xf32, #tpu.memory_space<vmem>>, vector<1x4x324xf32>
    %30 = vector.shape_cast %29 : vector<1x4x324xf32> to vector<4x324xf32>
    %c4 = arith.constant 4 : index
    %c0_27 = arith.constant 0 : index
    %c0_28 = arith.constant 0 : index
    %31 = vector.load %arg3[%c4, %c0_27, %c0_28] : memref<9x32x4xf32, #tpu.memory_space<vmem>>, vector<1x32x4xf32>
    %32 = vector.shape_cast %31 : vector<1x32x4xf32> to vector<32x4xf32>
    %cst_29 = arith.constant dense<0.000000e+00> : vector<32x324xf32>
    %33 = tpu.matmul %32, %30, %cst_29 {dimension_numbers = #tpu.dot_dimension_numbers<[1], [0], [0], [1], [0, 0, 1, 1], [], []>} : vector<32x4xf32>, vector<4x324xf32>, vector<32x324xf32> -> vector<32x324xf32>
    %34 = arith.addf %28, %33 : vector<32x324xf32>
    %c0_30 = arith.constant 0 : index
    %c0_31 = arith.constant 0 : index
    %c129 = arith.constant 129 : index
    %35 = vector.load %arg1[%c0_30, %c0_31, %c129] : memref<1x4x512xf32, #tpu.memory_space<vmem>>, vector<1x4x324xf32>
    %36 = vector.shape_cast %35 : vector<1x4x324xf32> to vector<4x324xf32>
    %c5 = arith.constant 5 : index
    %c0_32 = arith.constant 0 : index
    %c0_33 = arith.constant 0 : index
    %37 = vector.load %arg3[%c5, %c0_32, %c0_33] : memref<9x32x4xf32, #tpu.memory_space<vmem>>, vector<1x32x4xf32>
    %38 = vector.shape_cast %37 : vector<1x32x4xf32> to vector<32x4xf32>
    %cst_34 = arith.constant dense<0.000000e+00> : vector<32x324xf32>
    %39 = tpu.matmul %38, %36, %cst_34 {dimension_numbers = #tpu.dot_dimension_numbers<[1], [0], [0], [1], [0, 0, 1, 1], [], []>} : vector<32x4xf32>, vector<4x324xf32>, vector<32x324xf32> -> vector<32x324xf32>
    %40 = arith.addf %34, %39 : vector<32x324xf32>
    %c0_35 = arith.constant 0 : index
    %c0_36 = arith.constant 0 : index
    %c145 = arith.constant 145 : index
    %41 = vector.load %arg1[%c0_35, %c0_36, %c145] : memref<1x4x512xf32, #tpu.memory_space<vmem>>, vector<1x4x324xf32>
    %42 = vector.shape_cast %41 : vector<1x4x324xf32> to vector<4x324xf32>
    %c6 = arith.constant 6 : index
    %c0_37 = arith.constant 0 : index
    %c0_38 = arith.constant 0 : index
    %43 = vector.load %arg3[%c6, %c0_37, %c0_38] : memref<9x32x4xf32, #tpu.memory_space<vmem>>, vector<1x32x4xf32>
    %44 = vector.shape_cast %43 : vector<1x32x4xf32> to vector<32x4xf32>
    %cst_39 = arith.constant dense<0.000000e+00> : vector<32x324xf32>
    %45 = tpu.matmul %44, %42, %cst_39 {dimension_numbers = #tpu.dot_dimension_numbers<[1], [0], [0], [1], [0, 0, 1, 1], [], []>} : vector<32x4xf32>, vector<4x324xf32>, vector<32x324xf32> -> vector<32x324xf32>
    %46 = arith.addf %40, %45 : vector<32x324xf32>
    %c0_40 = arith.constant 0 : index
    %c0_41 = arith.constant 0 : index
    %c146 = arith.constant 146 : index
    %47 = vector.load %arg1[%c0_40, %c0_41, %c146] : memref<1x4x512xf32, #tpu.memory_space<vmem>>, vector<1x4x324xf32>
    %48 = vector.shape_cast %47 : vector<1x4x324xf32> to vector<4x324xf32>
    %c7 = arith.constant 7 : index
    %c0_42 = arith.constant 0 : index
    %c0_43 = arith.constant 0 : index
    %49 = vector.load %arg3[%c7, %c0_42, %c0_43] : memref<9x32x4xf32, #tpu.memory_space<vmem>>, vector<1x32x4xf32>
    %50 = vector.shape_cast %49 : vector<1x32x4xf32> to vector<32x4xf32>
    %cst_44 = arith.constant dense<0.000000e+00> : vector<32x324xf32>
    %51 = tpu.matmul %50, %48, %cst_44 {dimension_numbers = #tpu.dot_dimension_numbers<[1], [0], [0], [1], [0, 0, 1, 1], [], []>} : vector<32x4xf32>, vector<4x324xf32>, vector<32x324xf32> -> vector<32x324xf32>
    %52 = arith.addf %46, %51 : vector<32x324xf32>
    %c0_45 = arith.constant 0 : index
    %c0_46 = arith.constant 0 : index
    %c147 = arith.constant 147 : index
    %53 = vector.load %arg1[%c0_45, %c0_46, %c147] : memref<1x4x512xf32, #tpu.memory_space<vmem>>, vector<1x4x324xf32>
    %54 = vector.shape_cast %53 : vector<1x4x324xf32> to vector<4x324xf32>
    %c8 = arith.constant 8 : index
    %c0_47 = arith.constant 0 : index
    %c0_48 = arith.constant 0 : index
    %55 = vector.load %arg3[%c8, %c0_47, %c0_48] : memref<9x32x4xf32, #tpu.memory_space<vmem>>, vector<1x32x4xf32>
    %56 = vector.shape_cast %55 : vector<1x32x4xf32> to vector<32x4xf32>
    %cst_49 = arith.constant dense<0.000000e+00> : vector<32x324xf32>
    %57 = tpu.matmul %56, %54, %cst_49 {dimension_numbers = #tpu.dot_dimension_numbers<[1], [0], [0], [1], [0, 0, 1, 1], [], []>} : vector<32x4xf32>, vector<4x324xf32>, vector<32x324xf32> -> vector<32x324xf32>
    %58 = arith.addf %52, %57 : vector<32x324xf32>
    %c0_50 = arith.constant 0 : index
    %c0_51 = arith.constant 0 : index
    %59 = vector.load %arg4[%c0_50, %c0_51] : memref<32x1xf32, #tpu.memory_space<vmem>>, vector<32x1xf32>
    %60 = vector.broadcast %59 : vector<32x1xf32> to vector<32x324xf32>
    %61 = arith.addf %58, %60 : vector<32x324xf32>
    %cst_52 = arith.constant 0.000000e+00 : f32
    %62 = vector.broadcast %cst_52 : f32 to vector<32x324xf32>
    %63 = arith.maximumf %61, %62 : vector<32x324xf32>
    %c0_53 = arith.constant 0 : index
    %c0_54 = arith.constant 0 : index
    %64 = vector.load %arg2[%c0_53, %c0_54] : memref<1x324xf32, #tpu.memory_space<vmem>>, vector<1x324xf32>
    %65 = vector.broadcast %64 : vector<1x324xf32> to vector<32x324xf32>
    %66 = arith.mulf %63, %65 : vector<32x324xf32>
    %c0_55 = arith.constant 0 : index
    %c128_56 = arith.constant 128 : index
    %67 = vector.load %arg10[%c0_55, %c128_56] : memref<32x512xf32, #tpu.memory_space<vmem>>, vector<32x324xf32>
    tpu.vector_store %arg10[%c0_55, %c128_56], %66 {strides = array<i32>} : memref<32x512xf32, #tpu.memory_space<vmem>>, vector<32x324xf32>,
    %cst_57 = arith.constant 0.000000e+00 : f32
    %68 = vector.broadcast %cst_57 : f32 to vector<32x324xf32>
    %c0_58 = arith.constant 0 : index
    %c109_59 = arith.constant 109 : index
    %69 = vector.load %arg10[%c0_58, %c109_59] : memref<32x512xf32, #tpu.memory_space<vmem>>, vector<32x324xf32>
    %c0_60 = arith.constant 0 : index
    %c0_61 = arith.constant 0 : index
    %c0_62 = arith.constant 0 : index
    %70 = vector.load %arg5[%c0_60, %c0_61, %c0_62] : memref<9x32x32xf32, #tpu.memory_space<vmem>>, vector<1x32x32xf32>
    %71 = vector.shape_cast %70 : vector<1x32x32xf32> to vector<32x32xf32>
    %cst_63 = arith.constant dense<0.000000e+00> : vector<32x324xf32>
    %72 = tpu.matmul %71, %69, %cst_63 {dimension_numbers = #tpu.dot_dimension_numbers<[1], [0], [0], [1], [0, 0, 1, 1], [], []>} : vector<32x32xf32>, vector<32x324xf32>, vector<32x324xf32> -> vector<32x324xf32>
    %73 = arith.addf %68, %72 : vector<32x324xf32>
    %c0_64 = arith.constant 0 : index
    %c110_65 = arith.constant 110 : index
    %74 = vector.load %arg10[%c0_64, %c110_65] : memref<32x512xf32, #tpu.memory_space<vmem>>, vector<32x324xf32>
    %c1_66 = arith.constant 1 : index
    %c0_67 = arith.constant 0 : index
    %c0_68 = arith.constant 0 : index
    %75 = vector.load %arg5[%c1_66, %c0_67, %c0_68] : memref<9x32x32xf32, #tpu.memory_space<vmem>>, vector<1x32x32xf32>
    %76 = vector.shape_cast %75 : vector<1x32x32xf32> to vector<32x32xf32>
    %cst_69 = arith.constant dense<0.000000e+00> : vector<32x324xf32>
    %77 = tpu.matmul %76, %74, %cst_69 {dimension_numbers = #tpu.dot_dimension_numbers<[1], [0], [0], [1], [0, 0, 1, 1], [], []>} : vector<32x32xf32>, vector<32x324xf32>, vector<32x324xf32> -> vector<32x324xf32>
    %78 = arith.addf %73, %77 : vector<32x324xf32>
    %c0_70 = arith.constant 0 : index
    %c111_71 = arith.constant 111 : index
    %79 = vector.load %arg10[%c0_70, %c111_71] : memref<32x512xf32, #tpu.memory_space<vmem>>, vector<32x324xf32>
    %c2_72 = arith.constant 2 : index
    %c0_73 = arith.constant 0 : index
    %c0_74 = arith.constant 0 : index
    %80 = vector.load %arg5[%c2_72, %c0_73, %c0_74] : memref<9x32x32xf32, #tpu.memory_space<vmem>>, vector<1x32x32xf32>
    %81 = vector.shape_cast %80 : vector<1x32x32xf32> to vector<32x32xf32>
    %cst_75 = arith.constant dense<0.000000e+00> : vector<32x324xf32>
    %82 = tpu.matmul %81, %79, %cst_75 {dimension_numbers = #tpu.dot_dimension_numbers<[1], [0], [0], [1], [0, 0, 1, 1], [], []>} : vector<32x32xf32>, vector<32x324xf32>, vector<32x324xf32> -> vector<32x324xf32>
    %83 = arith.addf %78, %82 : vector<32x324xf32>
    %c0_76 = arith.constant 0 : index
    %c127_77 = arith.constant 127 : index
    %84 = vector.load %arg10[%c0_76, %c127_77] : memref<32x512xf32, #tpu.memory_space<vmem>>, vector<32x324xf32>
    %c3_78 = arith.constant 3 : index
    %c0_79 = arith.constant 0 : index
    %c0_80 = arith.constant 0 : index
    %85 = vector.load %arg5[%c3_78, %c0_79, %c0_80] : memref<9x32x32xf32, #tpu.memory_space<vmem>>, vector<1x32x32xf32>
    %86 = vector.shape_cast %85 : vector<1x32x32xf32> to vector<32x32xf32>
    %cst_81 = arith.constant dense<0.000000e+00> : vector<32x324xf32>
    %87 = tpu.matmul %86, %84, %cst_81 {dimension_numbers = #tpu.dot_dimension_numbers<[1], [0], [0], [1], [0, 0, 1, 1], [], []>} : vector<32x32xf32>, vector<32x324xf32>, vector<32x324xf32> -> vector<32x324xf32>
    %88 = arith.addf %83, %87 : vector<32x324xf32>
    %c0_82 = arith.constant 0 : index
    %c128_83 = arith.constant 128 : index
    %89 = vector.load %arg10[%c0_82, %c128_83] : memref<32x512xf32, #tpu.memory_space<vmem>>, vector<32x324xf32>
    %c4_84 = arith.constant 4 : index
    %c0_85 = arith.constant 0 : index
    %c0_86 = arith.constant 0 : index
    %90 = vector.load %arg5[%c4_84, %c0_85, %c0_86] : memref<9x32x32xf32, #tpu.memory_space<vmem>>, vector<1x32x32xf32>
    %91 = vector.shape_cast %90 : vector<1x32x32xf32> to vector<32x32xf32>
    %cst_87 = arith.constant dense<0.000000e+00> : vector<32x324xf32>
    %92 = tpu.matmul %91, %89, %cst_87 {dimension_numbers = #tpu.dot_dimension_numbers<[1], [0], [0], [1], [0, 0, 1, 1], [], []>} : vector<32x32xf32>, vector<32x324xf32>, vector<32x324xf32> -> vector<32x324xf32>
    %93 = arith.addf %88, %92 : vector<32x324xf32>
    %c0_88 = arith.constant 0 : index
    %c129_89 = arith.constant 129 : index
    %94 = vector.load %arg10[%c0_88, %c129_89] : memref<32x512xf32, #tpu.memory_space<vmem>>, vector<32x324xf32>
    %c5_90 = arith.constant 5 : index
    %c0_91 = arith.constant 0 : index
    %c0_92 = arith.constant 0 : index
    %95 = vector.load %arg5[%c5_90, %c0_91, %c0_92] : memref<9x32x32xf32, #tpu.memory_space<vmem>>, vector<1x32x32xf32>
    %96 = vector.shape_cast %95 : vector<1x32x32xf32> to vector<32x32xf32>
    %cst_93 = arith.constant dense<0.000000e+00> : vector<32x324xf32>
    %97 = tpu.matmul %96, %94, %cst_93 {dimension_numbers = #tpu.dot_dimension_numbers<[1], [0], [0], [1], [0, 0, 1, 1], [], []>} : vector<32x32xf32>, vector<32x324xf32>, vector<32x324xf32> -> vector<32x324xf32>
    %98 = arith.addf %93, %97 : vector<32x324xf32>
    %c0_94 = arith.constant 0 : index
    %c145_95 = arith.constant 145 : index
    %99 = vector.load %arg10[%c0_94, %c145_95] : memref<32x512xf32, #tpu.memory_space<vmem>>, vector<32x324xf32>
    %c6_96 = arith.constant 6 : index
    %c0_97 = arith.constant 0 : index
    %c0_98 = arith.constant 0 : index
    %100 = vector.load %arg5[%c6_96, %c0_97, %c0_98] : memref<9x32x32xf32, #tpu.memory_space<vmem>>, vector<1x32x32xf32>
    %101 = vector.shape_cast %100 : vector<1x32x32xf32> to vector<32x32xf32>
    %cst_99 = arith.constant dense<0.000000e+00> : vector<32x324xf32>
    %102 = tpu.matmul %101, %99, %cst_99 {dimension_numbers = #tpu.dot_dimension_numbers<[1], [0], [0], [1], [0, 0, 1, 1], [], []>} : vector<32x32xf32>, vector<32x324xf32>, vector<32x324xf32> -> vector<32x324xf32>
    %103 = arith.addf %98, %102 : vector<32x324xf32>
    %c0_100 = arith.constant 0 : index
    %c146_101 = arith.constant 146 : index
    %104 = vector.load %arg10[%c0_100, %c146_101] : memref<32x512xf32, #tpu.memory_space<vmem>>, vector<32x324xf32>
    %c7_102 = arith.constant 7 : index
    %c0_103 = arith.constant 0 : index
    %c0_104 = arith.constant 0 : index
    %105 = vector.load %arg5[%c7_102, %c0_103, %c0_104] : memref<9x32x32xf32, #tpu.memory_space<vmem>>, vector<1x32x32xf32>
    %106 = vector.shape_cast %105 : vector<1x32x32xf32> to vector<32x32xf32>
    %cst_105 = arith.constant dense<0.000000e+00> : vector<32x324xf32>
    %107 = tpu.matmul %106, %104, %cst_105 {dimension_numbers = #tpu.dot_dimension_numbers<[1], [0], [0], [1], [0, 0, 1, 1], [], []>} : vector<32x32xf32>, vector<32x324xf32>, vector<32x324xf32> -> vector<32x324xf32>
    %108 = arith.addf %103, %107 : vector<32x324xf32>
    %c0_106 = arith.constant 0 : index
    %c147_107 = arith.constant 147 : index
    %109 = vector.load %arg10[%c0_106, %c147_107] : memref<32x512xf32, #tpu.memory_space<vmem>>, vector<32x324xf32>
    %c8_108 = arith.constant 8 : index
    %c0_109 = arith.constant 0 : index
    %c0_110 = arith.constant 0 : index
    %110 = vector.load %arg5[%c8_108, %c0_109, %c0_110] : memref<9x32x32xf32, #tpu.memory_space<vmem>>, vector<1x32x32xf32>
    %111 = vector.shape_cast %110 : vector<1x32x32xf32> to vector<32x32xf32>
    %cst_111 = arith.constant dense<0.000000e+00> : vector<32x324xf32>
    %112 = tpu.matmul %111, %109, %cst_111 {dimension_numbers = #tpu.dot_dimension_numbers<[1], [0], [0], [1], [0, 0, 1, 1], [], []>} : vector<32x32xf32>, vector<32x324xf32>, vector<32x324xf32> -> vector<32x324xf32>
    %113 = arith.addf %108, %112 : vector<32x324xf32>
    %c0_112 = arith.constant 0 : index
    %c0_113 = arith.constant 0 : index
    %114 = vector.load %arg6[%c0_112, %c0_113] : memref<32x1xf32, #tpu.memory_space<vmem>>, vector<32x1xf32>
    %115 = vector.broadcast %114 : vector<32x1xf32> to vector<32x324xf32>
    %116 = arith.addf %113, %115 : vector<32x324xf32>
    %cst_114 = arith.constant 0.000000e+00 : f32
    %117 = vector.broadcast %cst_114 : f32 to vector<32x324xf32>
    %118 = arith.maximumf %116, %117 : vector<32x324xf32>
    %c0_115 = arith.constant 0 : index
    %c0_116 = arith.constant 0 : index
    %119 = vector.load %arg7[%c0_115, %c0_116] : memref<8x32xf32, #tpu.memory_space<vmem>>, vector<8x32xf32>
    %cst_117 = arith.constant dense<0.000000e+00> : vector<8x324xf32>
    %120 = tpu.matmul %119, %118, %cst_117 {dimension_numbers = #tpu.dot_dimension_numbers<[1], [0], [0], [1], [0, 0, 1, 1], [], []>} : vector<8x32xf32>, vector<32x324xf32>, vector<8x324xf32> -> vector<8x324xf32>
    %c0_118 = arith.constant 0 : index
    %c0_119 = arith.constant 0 : index
    %121 = vector.load %arg8[%c0_118, %c0_119] : memref<8x1xf32, #tpu.memory_space<vmem>>, vector<8x1xf32>
    %122 = vector.broadcast %121 : vector<8x1xf32> to vector<8x324xf32>
    %123 = arith.addf %120, %122 : vector<8x324xf32>
    %c0_120 = arith.constant 0 : index
    %c0_121 = arith.constant 0 : index
    %c0_122 = arith.constant 0 : index
    %124 = vector.load %arg9[%c0_120, %c0_121, %c0_122] : memref<1x8x324xf32, #tpu.memory_space<vmem>>, vector<1x8x324xf32>
    %125 = vector.shape_cast %124 : vector<1x8x324xf32> to vector<8x324xf32>
    %126 = vector.shape_cast %123 : vector<8x324xf32> to vector<1x8x324xf32>
    tpu.vector_store %arg9[%c0_120, %c0_121, %c0_122], %126 {strides = array<i32>} : memref<1x8x324xf32, #tpu.memory_space<vmem>>, vector<1x8x324xf32>,
    return
  }
  func.func @transform_0(%arg0: i32) -> (i32, i32, i32) {
    %c0_i32 = arith.constant 0 : i32
    %c0_i32_0 = arith.constant 0 : i32
    %c0_i32_1 = arith.constant 0 : i32
    return %arg0, %c0_i32, %c0_i32_0 : i32, i32, i32
  }
  func.func @transform_1(%arg0: i32) -> (i32, i32) {
    %c0_i32 = arith.constant 0 : i32
    %c0_i32_0 = arith.constant 0 : i32
    %c0_i32_1 = arith.constant 0 : i32
    return %c0_i32, %c0_i32_0 : i32, i32
  }
  func.func @transform_2(%arg0: i32) -> (i32, i32, i32) {
    %c0_i32 = arith.constant 0 : i32
    %c0_i32_0 = arith.constant 0 : i32
    %c0_i32_1 = arith.constant 0 : i32
    %c0_i32_2 = arith.constant 0 : i32
    return %c0_i32, %c0_i32_0, %c0_i32_1 : i32, i32, i32
  }
  func.func @transform_3(%arg0: i32) -> (i32, i32) {
    %c0_i32 = arith.constant 0 : i32
    %c0_i32_0 = arith.constant 0 : i32
    %c0_i32_1 = arith.constant 0 : i32
    return %c0_i32, %c0_i32_0 : i32, i32
  }
  func.func @transform_4(%arg0: i32) -> (i32, i32, i32) {
    %c0_i32 = arith.constant 0 : i32
    %c0_i32_0 = arith.constant 0 : i32
    %c0_i32_1 = arith.constant 0 : i32
    %c0_i32_2 = arith.constant 0 : i32
    return %c0_i32, %c0_i32_0, %c0_i32_1 : i32, i32, i32
  }
  func.func @transform_5(%arg0: i32) -> (i32, i32) {
    %c0_i32 = arith.constant 0 : i32
    %c0_i32_0 = arith.constant 0 : i32
    %c0_i32_1 = arith.constant 0 : i32
    return %c0_i32, %c0_i32_0 : i32, i32
  }
  func.func @transform_6(%arg0: i32) -> (i32, i32) {
    %c0_i32 = arith.constant 0 : i32
    %c0_i32_0 = arith.constant 0 : i32
    %c0_i32_1 = arith.constant 0 : i32
    return %c0_i32, %c0_i32_0 : i32, i32
  }
  func.func @transform_7(%arg0: i32) -> (i32, i32) {
    %c0_i32 = arith.constant 0 : i32
    %c0_i32_0 = arith.constant 0 : i32
    %c0_i32_1 = arith.constant 0 : i32
    return %c0_i32, %c0_i32_0 : i32, i32
  }
  func.func @transform_8(%arg0: i32) -> (i32, i32, i32) {
    %c0_i32 = arith.constant 0 : i32
    %c0_i32_0 = arith.constant 0 : i32
    %c0_i32_1 = arith.constant 0 : i32
    return %arg0, %c0_i32, %c0_i32_0 : i32, i32, i32
  }
}

</mosaic_0001>

<bundles_post_ra>
// kernel: single_head_forward.1
= control target key start
LH: loop header
LB: loop body
LE: loop exit
PB: predicated region body
PF: predicated region fallthrough
CT: control target
= control target key end

     0   :  { %s6183_s27 = smov 0   ;;  %s7377_s0 = inlined_call_operand.vmem [shape: f32[2,4,512], index: 0, kind: input, shape index: {}]   ;;  %s7378_s1 = inlined_call_operand.vmem [shape: f32[1,324], index: 1, kind: input, shape index: {}]   ;;  %s7379_s2 = inlined_call_operand.vmem [shape: f32[9,32,4], index: 2, kind: input, shape index: {}]   ;;  %s7380_s3 = inlined_call_operand.vmem [shape: f32[32,1], index: 3, kind: input, shape index: {}]   ;;  %s7381_s4 = inlined_call_operand.vmem [shape: f32[9,32,32], index: 4, kind: input, shape index: {}]   ;;  %s7382_s5 = inlined_call_operand.vmem [shape: f32[32,1], index: 5, kind: input, shape index: {}]   ;;  %s7383_s6 = inlined_call_operand.vmem [shape: f32[8,32], index: 6, kind: input, shape index: {}]   ;;  %s7384_s7 = inlined_call_operand.vmem [shape: f32[8,1], index: 7, kind: input, shape index: {}]   ;;  %s7385_s8 = inlined_call_operand.vmem [shape: f32[2,8,324], index: 8, kind: output, shape index: {}]  }
   0x1 LB: > { %s4882_s28 = sadd.s32 4294967295, %s6124_s27   ;;  %p4886_p0 = scmp.ge.s32.totalorder %s6124_s27, 1  ;;  %s6124_s27 = sphi %s6183_s27, %s18_s27  }
   0x2   : > { %p262_p1 = scmp.lt.s32.totalorder %s6124_s27, 3 }
   0x4   : > { %p263_p2 = pnand %p4886_p0, %p262_p1 }
   0x5   : > { %p296_p3 = scmp.lt.s32.totalorder (!%p263_p2), %s4882_s28, 1  ;;  %v6126_v0 = vmov (!%p263_p2), 0.0   ;;  %v6198_v1 = vld [vmem:[%s7379_s2 + $0x20] sm:$0xff] (!%p263_p2)  ;;  %vm342_vm0 = vcmask (!%p263_p2), 31744   ;;  %s6127_s13 = smov (!%p263_p2), 18   ;;  %vm338_vm1 = vcmask (!%p263_p2), 146432  }
   0x6   : > { %266 = sbr.rel (%p263_p2) target bundleno = 1214 (0x4be), region = 52  ;;  %426 = vmatprep.mubr.f32.mxu0 (!%p263_p2), %v6126_v0  ;;  %306 = vst [vmem:[#allocation2] sm:$0xff] (!%p263_p2), %v6126_v0  ;;  %5254 = vmatprep.mubr.msk.f32.mxu1 (!%p263_p2), %vm342_vm0, %v6198_v1  ;;  %s6128_s14 = smov (!%p263_p2), 19   ;;  %vm355_vm2 = vcmask (!%p263_p2), 1043456   ;;  %vm544_vm3 = vcmask (!%p263_p2), 154624   ;;  %v4891_v22 = vld [vmem:[%s7379_s2 + $0x28] sm:$0xff] (!%p263_p2) }
   0x7   : > { %s6129_s15 = smov (!%p263_p2), 17   ;;  %s6130_s16 = smov (!%p263_p2), 1   ;;  %vm759_vm4 = vcmask (!%p263_p2), 138240   ;;  %v4892_v26 = vld [vmem:[%s7379_s2 + $0x30] sm:$0xff] (!%p263_p2)  ;;  %v4893_v29 = vld [vmem:[%s7379_s2 + $0x38] sm:$0xff] (!%p263_p2)  ;;  %vm986_vm5 = vcmask (!%p263_p2), 7168  }
   0x8   : > { %s6131_s17 = smov (!%p263_p2), 127   ;;  %s6132_s18 = smov (!%p263_p2), 111   ;;  %v2301_v32 = vld [vmem:[%s7380_s3 + $0x8] sm:$0xff] (!%p263_p2)  ;;  %v2300_v33 = vld [vmem:[%s7380_s3] sm:$0xff] (!%p263_p2)  ;;  %v6135_v35 = vmov (!%p263_p2), 0   ;;  %vm310_vm6 = vcmask (!%p263_p2), 1048096  }
   0x9   : > { %s6133_s19 = smov (!%p263_p2), 110   ;;  %s6134_s20 = smov (!%p263_p2), 109   ;;  %v317_v34 = vld [vmem:[%s7379_s2] sm:$0xff] (!%p263_p2)  ;;  %5833 = vset.pattern.permute.xlu1 (!%p263_p2), %v6135_v35  ;;  %5832 = vset.pattern.permute.xlu0 (!%p263_p2), %v6135_v35  ;;  %312 = vst.msk [vmem:[#allocation2 + $0x38] sm:$0xff] (!%p263_p2), %vm310_vm6, %v6126_v0  ;;  %311 = vst.msk [vmem:[#allocation2 + $0x18] sm:$0xff] (!%p263_p2), %vm310_vm6, %v6126_v0  ;;  %v2303_v40 = vld [vmem:[%s7380_s3 + $0x18] sm:$0xff] (!%p263_p2) }
   0xa   : > { %313 = vst.msk [vmem:[#allocation2 + $0x58] sm:$0xff] (!%p263_p2), %vm310_vm6, %v6126_v0  ;;  %314 = vst.msk [vmem:[#allocation2 + $0x78] sm:$0xff] (!%p263_p2), %vm310_vm6, %v6126_v0  ;;  %v318_v42 = vld [vmem:[%s7379_s2 + $0x8] sm:$0xff] (!%p263_p2)  ;;  %v2302_v46 = vld [vmem:[%s7380_s3 + $0x10] sm:$0xff] (!%p263_p2)  ;;  %vm1424_vm7 = vcmask (!%p263_p2), 1039360   ;;  %vm1647_vm8 = vcmask (!%p263_p2), 908288  }
   0xb   : > { %v319_v47 = vld [vmem:[%s7379_s2 + $0x10] sm:$0xff] (!%p263_p2)  ;;  %v320_v51 = vld [vmem:[%s7379_s2 + $0x18] sm:$0xff] (!%p263_p2)  ;;  %v4916_v53 = vld [vmem:[%s7379_s2 + $0x40] sm:$0xff] (!%p263_p2)  ;;  %vm1870_vm9 = vcmask (!%p263_p2), 900096   ;;  %vm2093_vm10 = vcmask (!%p263_p2), 891904   ;;  %vm2379_vm11 = vcmask (!%p263_p2), 556032  }
   0xc   : > { %v4917_v56 = vld [vmem:[%s7379_s2 + $0x48] sm:$0xff] (!%p263_p2)  ;;  %v4918_v57 = vld [vmem:[%s7379_s2 + $0x50] sm:$0xff] (!%p263_p2)  ;;  %v4919_v59 = vld [vmem:[%s7379_s2 + $0x58] sm:$0xff] (!%p263_p2)  ;;  %vm2487_vm12 = vcmask (!%p263_p2), 261120   ;;  %vm6137_vm13 = vmmov (!%p263_p2), 0  }
   0xd   : > { %s7417_s28 = smov (!%p296_p3, %s4882_s28), 1  ;;  %v4931_v60 = vld [vmem:[%s7379_s2 + $0x60] sm:$0xff]  ;;  %v4932_v61 = vld [vmem:[%s7379_s2 + $0x68] sm:$0xff]  ;;  %v4933_v62 = vld [vmem:[%s7379_s2 + $0x70] sm:$0xff] }
   0xe   : > { %s5129_s9 = sshll.u32 %s7417_s28, 4  ;;  %v4934_v63 = vld [vmem:[%s7379_s2 + $0x78] sm:$0xff] }
   0xf   : > { %s6206_s12 = scalar_lea.vmem %s7377_s0, %s5129_s9 }
  0x10   : > { %v315_v2 = vld [vmem:[%s6206_s12] sm:$0xff]  ;;  %v316_v4 = vld [vmem:[%s6206_s12 + $0x8] sm:$0xff] }
  0x11   : > { %330 = vrot.lane.b32.xlu1 %v315_v2, %s6127_s13  ;;  %v328_v3 = vcombine.high %v315_v2, %v315_v2  ;;  %v750_v5 = vcombine.high %v316_v4, %v316_v4  ;;  %v6223_v6 = vld [vmem:[%s6206_s12 + $0x4] sm:$0xff]  ;;  %v1409_v7 = vld [vmem:[%s6206_s12 + $0xc] sm:$0xf] }
  0x12   : > { %v6230_v8 = vcombine.high %v6223_v6, %v6223_v6  ;;  %v1632_v9 = vld [vmem:[%s6206_s12 + $0xc] sm:$0xf] }
  0x13   : > { %332 = vrot.lane.b32.xlu0 %v328_v3, %s6127_s13  ;;  %v1855_v10 = vld [vmem:[%s6206_s12 + $0xc] sm:$0xf] }
  0x14   : > { %v2078_v11 = vld [vmem:[%s6206_s12 + $0xc] sm:$0xf] }
  0x15   : > { %538 = vrot.lane.b32.xlu1 %v328_v3, %s6128_s14  ;;  %v1195_v58 = vld [vmem:[%s6206_s12 + $0xc] sm:$0xf] }
  0x17   : > { %334 = vrot.lane.b32.xlu0 %v316_v4, %s6127_s13 }
  0x19   : > { %536 = vrot.lane.b32.xlu1 %v315_v2, %s6128_s14 }
  0x1b   : > { %540 = vrot.lane.b32.xlu0 %v316_v4, %s6128_s14 }
  0x1d   : > { %755 = vrot.lane.b32.xlu1 %v316_v4, %s6129_s15 }
  0x1f   : > { %753 = vrot.lane.b32.xlu0 %v328_v3, %s6129_s15 }
  0x21   : > { %980 = vrot.lane.b32.xlu1 %v328_v3, %s6130_s16 }
  0x23   : > { %751 = vrot.lane.b32.xlu0 %v315_v2, %s6129_s15 }
  0x25   : > { %978 = vrot.lane.b32.xlu1 %v315_v2, %s6130_s16 }
  0x27   : > { %982 = vrot.lane.b32.xlu0 %v316_v4, %s6130_s16  ;;  %v4947_v4 = vld [vmem:[%s7379_s2 + $0x88] sm:$0xff] }
  0x29   : > { %542 = vrot.lane.b32.xlu1 %v750_v5, %s6128_s14 }
  0x2b   : > { %336 = vrot.lane.b32.xlu0 %v750_v5, %s6127_s13 }
  0x2d   : > { %1422 = vrot.lane.b32.xlu1 %v1409_v7, %s6131_s17 }
  0x2f   : > { %1420 = vrot.lane.b32.xlu0 %v6230_v8, %s6131_s17 }
  0x31   : > { %757 = vrot.lane.b32.xlu1 %v750_v5, %s6129_s15 }
  0x33   : > { %1418 = vrot.lane.b32.xlu0 %v6223_v6, %s6131_s17 }
  0x35   : > { %1643 = vrot.lane.b32.xlu1 %v6230_v8, %s6132_s18 }
  0x37   : > { %984 = vrot.lane.b32.xlu0 %v750_v5, %s6130_s16  ;;  %v4948_v5 = vld [vmem:[%s7379_s2 + $0x90] sm:$0xff] }
  0x39   : > { %1641 = vrot.lane.b32.xlu1 %v6223_v6, %s6132_s18 }
  0x3b   : > { %1645 = vrot.lane.b32.xlu0 %v1632_v9, %s6132_s18 }
  0x3d   : > { %1868 = vrot.lane.b32.xlu1 %v1855_v10, %s6133_s19 }
  0x3f   : > { %1866 = vrot.lane.b32.xlu0 %v6230_v8, %s6133_s19 }
  0x41   : > { %2089 = vrot.lane.b32.xlu1 %v6230_v8, %s6134_s20 }
  0x43   : > { %1864 = vrot.lane.b32.xlu0 %v6223_v6, %s6133_s19 }
  0x45   : > { %2087 = vrot.lane.b32.xlu1 %v6223_v6, %s6134_s20 }
  0x47   : > { %2091 = vrot.lane.b32.xlu0 %v2078_v11, %s6134_s20  ;;  %v4962_v11 = vld [vmem:[%s7379_s2 + $0xa8] sm:$0xff] }
  0x49   : > { %2311 = vperm.xlu1 %5833, %v2301_v32   ;;  %v5009_v32 = vld [vmem:[%s7379_s2 + $0x118] sm:$0xff] }
  0x4b   : > { %2306 = vperm.xlu0 %5832, %v2300_v33  }
  0x4d   : > { %2316 = vperm.xlu1 %5833, %v2302_v46  }
  0x4f   : > { %2321 = vperm.xlu0 %5832, %v2303_v40  }
  0x83   : > { %v331_v12 = vpop.permute.xlu1 %330 }
  0x85   : > { %v333_v13 = vpop.permute.xlu0 %332 }
  0x86   : > { %v339_v18 = vsel %vm338_vm1, %v331_v12, %v333_v13  ;;  %v4963_v12 = vld [vmem:[%s7379_s2 + $0xb0] sm:$0xff] }
  0x87   : > { %v539_v14 = vpop.permute.xlu1 %538 }
  0x89   : > { %v335_v15 = vpop.permute.xlu0 %334 }
  0x8a   : > { %v340_v16 = vsel %vm338_vm1, %v333_v13, %v335_v15 }
  0x8b   : > { %v537_v17 = vpop.permute.xlu1 %536  ;;  %4894 = vmatprep.subr.msk.mxu0 %vm355_vm2, %v340_v16 }
  0x8c   : > { %4895 = vmatpush1.msk.msra.mxu0 %vm355_vm2, %v339_v18  ;;  %v545_v19 = vsel %vm544_vm3, %v537_v17, %v539_v14  ;;  %v4976_v17 = vld [vmem:[%s7379_s2 + $0xc0] sm:$0xff] }
  0x8d   : > { %4896 = vmatmul.mubr.msk.f32.vlgmr.msra.gmra.mrb[0].mxu0 %vm342_vm0, %v6198_v1  ;;  %v541_v20 = vpop.permute.xlu0 %540  ;;  %v4946_v1 = vld [vmem:[%s7379_s2 + $0x80] sm:$0xff] }
  0x8e   : > { %v546_v21 = vsel %vm544_vm3, %v539_v14, %v541_v20  ;;  %432 = vmatprep.mubr.f32.mxu0 %v6126_v0  ;;  %v4964_v14 = vld [vmem:[%s7379_s2 + $0xb8] sm:$0xff] }
  0x8f   : > { %v756_v23 = vpop.permute.xlu1 %755  ;;  %4905 = vmatprep.subr.msk.mxu0 %vm355_vm2, %v546_v21 }
  0x90   : > { %4906 = vmatpush1.msk.msra.mxu0 %vm355_vm2, %v545_v19  ;;  %v4977_v19 = vld [vmem:[%s7379_s2 + $0xc8] sm:$0xff] }
  0x91   : > { %4897 = vmatmul.mubr.msk.f32.gmra.mrb[2].mxu0 %vm342_vm0, %v4891_v22  ;;  %v754_v24 = vpop.permute.xlu0 %753 }
  0x92   : > { %v761_v25 = vsel %vm759_vm4, %v754_v24, %v756_v23  ;;  %438 = vmatprep.mubr.f32.mxu0 %v6126_v0 }
  0x93   : > { %v6277_v27 = vpop.permute.xlu1 %980  ;;  %4920 = vmatprep.subr.msk.mxu0 %vm355_vm2, %v761_v25  ;;  %v4993_v25 = vld [vmem:[%s7379_s2 + $0xf0] sm:$0xff] }
  0x95   : > { %4898 = vmatmul.mubr.msk.f32.gmra.mrb[4].mxu0 %vm342_vm0, %v4892_v26  ;;  %v752_v28 = vpop.permute.xlu0 %751 }
  0x96   : > { %444 = vmatprep.mubr.f32.mxu0 %v6126_v0  ;;  %v760_v36 = vsel %vm759_vm4, %v752_v28, %v754_v24  ;;  %v4992_v24 = vld [vmem:[%s7379_s2 + $0xe8] sm:$0xff] }
  0x97   : > { %v979_v30 = vpop.permute.xlu1 %978 }
  0x98   : > { %v987_v55 = vsel %vm986_vm5, %v979_v30, %v6277_v27  ;;  %v5007_v30 = vld [vmem:[%s7379_s2 + $0x108] sm:$0xff] }
  0x99   : > { %4899 = vmatmul.mubr.msk.f32.gmra.mrb[6].mxu0 %vm342_vm0, %v4893_v29  ;;  %v983_v31 = vpop.permute.xlu0 %982 }
  0x9a   : > { %630 = vmatprep.mubr.f32.mxu0 %v6126_v0  ;;  %v988_v38 = vsel %vm986_vm5, %v6277_v27, %v983_v31 }
  0x9b   : > { %v543_v37 = vpop.permute.xlu1 %542 }
  0x9c   : > { %v547_v44 = vsel %vm544_vm3, %v541_v20, %v543_v37  ;;  %v4978_v20 = vld [vmem:[%s7379_s2 + $0xd0] sm:$0xff] }
  0x9d   : > { %4907 = vmatmul.mubr.msk.f32.vlgmr.msra.gmra.mrb[0].mxu0 %vm342_vm0, %v317_v34  ;;  %v337_v39 = vpop.permute.xlu0 %336 }
  0x9e   : > { %4921 = vmatpush1.msk.msra.mxu0 %vm355_vm2, %v760_v36  ;;  %v341_v41 = vsel %vm338_vm1, %v335_v15, %v337_v39  ;;  %636 = vmatprep.mubr.f32.mxu0 %v6126_v0 }
  0x9f   : > { %v6313_v43 = vpop.permute.xlu1 %1422  ;;  %5252 = vmatprep.subr.msk.mxu1 %vm355_vm2, %v341_v41  ;;  %4935 = vmatprep.subr.msk.mxu0 %vm355_vm2, %v988_v38  ;;  %v2350_v38 = vlaneseq }
  0xa0   : > { %5253 = vmatpush3.msk.msra.mxu1 %vm355_vm2, %v341_v41 }
  0xa1   : > { %5255 = vmatmul.mubr.msk.f32.vlgmr.msra.gmra.mrb[0].mxu1 %vm342_vm0, %v4891_v22  ;;  %4908 = vmatmul.mubr.msk.f32.gmra.mrb[2].mxu0 %vm342_vm0, %v318_v42  ;;  %v6321_v45 = vpop.permute.xlu0 %1420  ;;  %v4979_v22 = vld [vmem:[%s7379_s2 + $0xd8] sm:$0xff]  ;;  %v2351_v39 = vshrl.u32 %v2350_v38, 7 }
  0xa2   : > { %5260 = vmatprep.subr.msk.mxu1 %vm355_vm2, %v547_v44  ;;  %5257 = vmatprep.mubr.msk.f32.mxu1 %vm342_vm0, %v4892_v26  ;;  %v1426_v2 = vsel %vm1424_vm7, %v6321_v45, %v6313_v43  ;;  %v4994_v26 = vld [vmem:[%s7379_s2 + $0xf8] sm:$0xff] }
  0xa3   : > { %5261 = vmatpush3.msk.msra.mxu1 %vm355_vm2, %v547_v44  ;;  %v758_v48 = vpop.permute.xlu1 %757  ;;  %642 = vmatprep.mubr.f32.mxu0 %v6126_v0 }
  0xa4   : > { %v762_v49 = vsel %vm759_vm4, %v756_v23, %v758_v48  ;;  %v4991_v23 = vld [vmem:[%s7379_s2 + $0xe0] sm:$0xff] }
  0xa5   : > { %5258 = vmatmul.mubr.msk.f32.gmra.mrb[2].mxu1 %vm342_vm0, %v4893_v29  ;;  %4909 = vmatmul.mubr.msk.f32.gmra.mrb[4].mxu0 %vm342_vm0, %v319_v47  ;;  %v6336_v50 = vpop.permute.xlu0 %1418  ;;  %v5006_v29 = vld [vmem:[%s7379_s2 + $0x100] sm:$0xff] }
  0xa6   : > { %5268 = vmatprep.subr.msk.mxu1 %vm355_vm2, %v762_v49  ;;  %648 = vmatprep.mubr.f32.mxu0 %v6126_v0  ;;  %v1425_v15 = vsel %vm1424_vm7, %v6336_v50, %v6321_v45 }
  0xa7   : > { %5262 = vmatprep.mubr.msk.f32.mxu1 %vm342_vm0, %v317_v34  ;;  %v6410_v3 = vpop.permute.xlu1 %1643 }
  0xa9   : > { %4910 = vmatmul.mubr.msk.f32.gmra.mrb[6].mxu0 %vm342_vm0, %v320_v51  ;;  %5263 = vmatmul.mubr.msk.f32.vlgmr.msra.gmra.mrb[0].mxu1 %vm342_vm0, %v318_v42  ;;  %v985_v52 = vpop.permute.xlu0 %984  ;;  %v2360_v42 = vsub.s32 2, %v2351_v39 }
  0xaa   : > { %5269 = vmatpush3.msk.msra.mxu1 %vm355_vm2, %v762_v49  ;;  %5265 = vmatprep.mubr.msk.f32.mxu1 %vm342_vm0, %v319_v47  ;;  %v989_v54 = vsel %vm986_vm5, %v983_v31, %v985_v52  ;;  %v5008_v31 = vld [vmem:[%s7379_s2 + $0x110] sm:$0xff] }
  0xab   : > { %845 = vmatprep.mubr.f32.mxu0 %v6126_v0  ;;  %5276 = vmatprep.subr.msk.mxu1 %vm355_vm2, %v989_v54  ;;  %v1642_v9 = vpop.permute.xlu1 %1641 }
  0xac   : > { %v1648_v27 = vsel %vm1647_vm8, %v1642_v9, %v6410_v3 }
  0xad   : > { %5266 = vmatmul.mubr.msk.f32.gmra.mrb[2].mxu1 %vm342_vm0, %v320_v51  ;;  %4922 = vmatmul.mubr.msk.f32.vlgmr.msra.gmra.mrb[0].mxu0 %vm342_vm0, %v4916_v53  ;;  %v1646_v7 = vpop.permute.xlu0 %1645 }
  0xae   : > { %4936 = vmatpush1.msk.msra.mxu0 %vm355_vm2, %v987_v55  ;;  %851 = vmatprep.mubr.f32.mxu0 %v6126_v0  ;;  %v1649_v18 = vsel %vm1647_vm8, %v6410_v3, %v1646_v7 }
  0xaf   : > { %5270 = vmatprep.mubr.msk.f32.mxu1 %vm342_vm0, %v4916_v53  ;;  %4950 = vmatprep.subr.msk.mxu0 %vm355_vm2, %v6230_v8  ;;  %v4949_v8 = vld [vmem:[%s7379_s2 + $0x98] sm:$0xff]  ;;  %v1869_v13 = vpop.permute.xlu1 %1868 }
  0xb1   : > { %4923 = vmatmul.mubr.msk.f32.gmra.mrb[2].mxu0 %vm342_vm0, %v4917_v56  ;;  %5271 = vmatmul.mubr.msk.f32.vlgmr.msra.gmra.mrb[0].mxu1 %vm342_vm0, %v4917_v56  ;;  %v6438_v10 = vpop.permute.xlu0 %1866 }
  0xb2   : > { %5277 = vmatpush3.msk.msra.mxu1 %vm355_vm2, %v989_v54  ;;  %857 = vmatprep.mubr.f32.mxu0 %v6126_v0  ;;  %v1872_v28 = vsel %vm1870_vm9, %v6438_v10, %v1869_v13 }
  0xb3   : > { %5273 = vmatprep.mubr.msk.f32.mxu1 %vm342_vm0, %v4918_v57  ;;  %5284 = vmatprep.subr.msk.mxu1 %vm355_vm2, %v1195_v58  ;;  %v2090_v34 = vpop.permute.xlu1 %2089 }
  0xb5   : > { %4924 = vmatmul.mubr.msk.f32.gmra.mrb[4].mxu0 %vm342_vm0, %v4918_v57  ;;  %5274 = vmatmul.mubr.msk.f32.gmra.mrb[2].mxu1 %vm342_vm0, %v4919_v59  ;;  %v1865_v16 = vpop.permute.xlu0 %1864 }
  0xb6   : > { %863 = vmatprep.mubr.f32.mxu0 %v6126_v0  ;;  %5278 = vmatprep.mubr.msk.f32.mxu1 %vm342_vm0, %v4931_v60  ;;  %v1871_v33 = vsel %vm1870_vm9, %v1865_v16, %v6438_v10 }
  0xb7   : > { %v2088_v36 = vpop.permute.xlu1 %2087 }
  0xb8   : > { %v2094_v37 = vsel %vm2093_vm10, %v2088_v36, %v2090_v34 }
  0xb9   : > { %4925 = vmatmul.mubr.msk.f32.gmra.mrb[6].mxu0 %vm342_vm0, %v4919_v59  ;;  %5279 = vmatmul.mubr.msk.f32.vlgmr.msra.gmra.mrb[0].mxu1 %vm342_vm0, %v4932_v61  ;;  %v2092_v21 = vpop.permute.xlu0 %2091 }
  0xba   : > { %1072 = vmatprep.mubr.f32.mxu0 %v6126_v0  ;;  %5281 = vmatprep.mubr.msk.f32.mxu1 %vm342_vm0, %v4933_v62  ;;  %v2095_v35 = vsel %vm2093_vm10, %v2090_v34, %v2092_v21 }
  0xbb   : > { %5285 = vmatpush3.msk.msra.mxu1 %vm355_vm2, %v1195_v58 }
  0xbc   : > { %5292 = vmatprep.subr.msk.mxu1 %vm355_vm2, %v6313_v43 }
  0xbd   : > { %4937 = vmatmul.mubr.msk.f32.vlgmr.msra.gmra.mrb[0].mxu0 %vm342_vm0, %v4931_v60  ;;  %5282 = vmatmul.mubr.msk.f32.gmra.mrb[2].mxu1 %vm342_vm0, %v4934_v63 }
  0xbe   : > { %1078 = vmatprep.mubr.f32.mxu0 %v6126_v0  ;;  %5286 = vmatprep.mubr.msk.f32.mxu1 %vm342_vm0, %v4946_v1 }
  0xbf   : > { %4951 = vmatpush1.msk.msra.mxu0 %vm355_vm2, %v6223_v6  ;;  %v4961_v6 = vld [vmem:[%s7379_s2 + $0xa0] sm:$0xff] }
  0xc0   : > { %4965 = vmatprep.subr.msk.mxu0 %vm355_vm2, %v1426_v2 }
  0xc1   : > { %4938 = vmatmul.mubr.msk.f32.gmra.mrb[2].mxu0 %vm342_vm0, %v4932_v61  ;;  %5287 = vmatmul.mubr.msk.f32.vlgmr.msra.gmra.mrb[0].mxu1 %vm342_vm0, %v4947_v4 }
  0xc2   : > { %1084 = vmatprep.mubr.f32.mxu0 %v6126_v0  ;;  %5289 = vmatprep.mubr.msk.f32.mxu1 %vm342_vm0, %v4948_v5 }
  0xc3   : > { %5293 = vmatpush3.msk.msra.mxu1 %vm355_vm2, %v6313_v43  ;;  %v2348_v43 = vld [vmem:[%s7378_s1] sm:$0x7] }
  0xc4   : > { %5300 = vmatprep.subr.msk.mxu1 %vm355_vm2, %v1646_v7  ;;  %v2361_v46 = vrot.slane %v2348_v43, %v2360_v42 }
  0xc5   : > { %4939 = vmatmul.mubr.msk.f32.gmra.mrb[4].mxu0 %vm342_vm0, %v4933_v62  ;;  %5290 = vmatmul.mubr.msk.f32.gmra.mrb[2].mxu1 %vm342_vm0, %v4949_v8 }
  0xc6   : > { %1090 = vmatprep.mubr.f32.mxu0 %v6126_v0  ;;  %5294 = vmatprep.mubr.msk.f32.mxu1 %vm342_vm0, %v4961_v6 }
  0xc8   : > { %v2312_v41 = vpop.permute.xlu1 %2311 }
  0xc9   : > { %4940 = vmatmul.mubr.msk.f32.gmra.mrb[6].mxu0 %vm342_vm0, %v4934_v63  ;;  %5295 = vmatmul.mubr.msk.f32.vlgmr.msra.gmra.mrb[0].mxu1 %vm342_vm0, %v4962_v11 }
  0xca   : > { %1286 = vmatprep.mubr.f32.mxu0 %v6126_v0  ;;  %5297 = vmatprep.mubr.msk.f32.mxu1 %vm342_vm0, %v4963_v12  ;;  %v2307_v40 = vpop.permute.xlu0 %2306 }
  0xcb   : > { %5301 = vmatpush3.msk.msra.mxu1 %vm355_vm2, %v1646_v7  ;;  %v2352_v7 = vsub.s32 0, %v2351_v39 }
  0xcc   : > { %5308 = vmatprep.subr.msk.mxu1 %vm355_vm2, %v1869_v13  ;;  %v2317_v51 = vpop.permute.xlu1 %2316 }
  0xcd   : > { %4952 = vmatmul.mubr.msk.f32.vlgmr.msra.gmra.mrb[0].mxu0 %vm342_vm0, %v4946_v1  ;;  %5298 = vmatmul.mubr.msk.f32.gmra.mrb[2].mxu1 %vm342_vm0, %v4964_v14  ;;  %v2353_v10 = vrot.slane %v2348_v43, %v2352_v7 }
  0xce   : > { %4966 = vmatpush1.msk.msra.mxu0 %vm355_vm2, %v1425_v15  ;;  %1292 = vmatprep.mubr.f32.mxu0 %v6126_v0  ;;  %v2322_v49 = vpop.permute.xlu0 %2321 }
  0xcf   : > { %5302 = vmatprep.mubr.msk.f32.mxu1 %vm342_vm0, %v4976_v17  ;;  %4980 = vmatprep.subr.msk.mxu0 %vm355_vm2, %v1649_v18 }
  0xd1   : > { %4953 = vmatmul.mubr.msk.f32.gmra.mrb[2].mxu0 %vm342_vm0, %v4947_v4  ;;  %5303 = vmatmul.mubr.msk.f32.vlgmr.msra.gmra.mrb[0].mxu1 %vm342_vm0, %v4977_v19 }
  0xd2   : > { %1298 = vmatprep.mubr.f32.mxu0 %v6126_v0  ;;  %5305 = vmatprep.mubr.msk.f32.mxu1 %vm342_vm0, %v4978_v20 }
  0xd3   : > { %5309 = vmatpush3.msk.msra.mxu1 %vm355_vm2, %v1869_v13 }
  0xd4   : > { %5316 = vmatprep.subr.msk.mxu1 %vm355_vm2, %v2092_v21 }
  0xd5   : > { %4954 = vmatmul.mubr.msk.f32.gmra.mrb[4].mxu0 %vm342_vm0, %v4948_v5  ;;  %5306 = vmatmul.mubr.msk.f32.gmra.mrb[2].mxu1 %vm342_vm0, %v4979_v22 }
  0xd6   : > { %1304 = vmatprep.mubr.f32.mxu0 %v6126_v0  ;;  %5310 = vmatprep.mubr.msk.f32.mxu1 %vm342_vm0, %v4991_v23 }
  0xd9   : > { %4955 = vmatmul.mubr.msk.f32.gmra.mrb[6].mxu0 %vm342_vm0, %v4949_v8  ;;  %5311 = vmatmul.mubr.msk.f32.vlgmr.msra.gmra.mrb[0].mxu1 %vm342_vm0, %v4992_v24  ;;  %v2356_v8 = vsub.s32 1, %v2351_v39 }
  0xda   : > { %1509 = vmatprep.mubr.f32.mxu0 %v6126_v0  ;;  %5313 = vmatprep.mubr.msk.f32.mxu1 %vm342_vm0, %v4993_v25 }
  0xdb   : > { %5317 = vmatpush3.msk.msra.mxu1 %vm355_vm2, %v2092_v21  ;;  %v2357_v13 = vrot.slane %v2348_v43, %v2356_v8 }
  0xdd   : > { %4967 = vmatmul.mubr.msk.f32.vlgmr.msra.gmra.mrb[0].mxu0 %vm342_vm0, %v4961_v6  ;;  %5314 = vmatmul.mubr.msk.f32.gmra.mrb[2].mxu1 %vm342_vm0, %v4994_v26 }
  0xde   : > { %4981 = vmatpush1.msk.msra.mxu0 %vm355_vm2, %v1648_v27  ;;  %1515 = vmatprep.mubr.f32.mxu0 %v6126_v0 }
  0xdf   : > { %5318 = vmatprep.mubr.msk.f32.mxu1 %vm342_vm0, %v5006_v29  ;;  %4995 = vmatprep.subr.msk.mxu0 %vm355_vm2, %v1872_v28 }
  0xe1   : > { %4968 = vmatmul.mubr.msk.f32.gmra.mrb[2].mxu0 %vm342_vm0, %v4962_v11  ;;  %5319 = vmatmul.mubr.msk.f32.vlgmr.msra.gmra.mrb[0].mxu1 %vm342_vm0, %v5007_v30 }
  0xe2   : > { %1521 = vmatprep.mubr.f32.mxu0 %v6126_v0  ;;  %5321 = vmatprep.mubr.msk.f32.mxu1 %vm342_vm0, %v5008_v31 }
  0xe5   : > { %4969 = vmatmul.mubr.msk.f32.gmra.mrb[4].mxu0 %vm342_vm0, %v4963_v12  ;;  %5322 = vmatmul.mubr.msk.f32.gmra.mrb[2].mxu1 %vm342_vm0, %v5009_v32 }
  0xe6   : > { %1527 = vmatprep.mubr.f32.mxu0 %v6126_v0 }
  0xe9   : > { %4970 = vmatmul.mubr.msk.f32.gmra.mrb[6].mxu0 %vm342_vm0, %v4964_v14 }
  0xea   : > { %1732 = vmatprep.mubr.f32.mxu0 %v6126_v0 }
  0xed   : > { %4982 = vmatmul.mubr.msk.f32.vlgmr.msra.gmra.mrb[0].mxu0 %vm342_vm0, %v4976_v17 }
  0xee   : > { %4996 = vmatpush1.msk.msra.mxu0 %vm355_vm2, %v1871_v33  ;;  %1738 = vmatprep.mubr.f32.mxu0 %v6126_v0 }
  0xef   : > { %5010 = vmatprep.subr.msk.mxu0 %vm355_vm2, %v2095_v35 }
  0xf1   : > { %4983 = vmatmul.mubr.msk.f32.gmra.mrb[2].mxu0 %vm342_vm0, %v4977_v19 }
  0xf2   : > { %1744 = vmatprep.mubr.f32.mxu0 %v6126_v0 }
  0xf5   : > { %4984 = vmatmul.mubr.msk.f32.gmra.mrb[4].mxu0 %vm342_vm0, %v4978_v20 }
  0xf6   : > { %1750 = vmatprep.mubr.f32.mxu0 %v6126_v0 }
  0xf9   : > { %4985 = vmatmul.mubr.msk.f32.gmra.mrb[6].mxu0 %vm342_vm0, %v4979_v22 }
  0xfa   : > { %1955 = vmatprep.mubr.f32.mxu0 %v6126_v0 }
  0xfd   : > { %4997 = vmatmul.mubr.msk.f32.vlgmr.msra.gmra.mrb[0].mxu0 %vm342_vm0, %v4991_v23 }
  0xfe   : > { %5011 = vmatpush1.msk.msra.mxu0 %vm355_vm2, %v2094_v37  ;;  %1961 = vmatprep.mubr.f32.mxu0 %v6126_v0 }
 0x101   : > { %4998 = vmatmul.mubr.msk.f32.gmra.mrb[2].mxu0 %vm342_vm0, %v4992_v24 }
 0x102   : > { %1967 = vmatprep.mubr.f32.mxu0 %v6126_v0 }
 0x105   : > { %4999 = vmatmul.mubr.msk.f32.gmra.mrb[4].mxu0 %vm342_vm0, %v4993_v25 }
 0x106   : > { %1973 = vmatprep.mubr.f32.mxu0 %v6126_v0 }
 0x109   : > { %5000 = vmatmul.mubr.msk.f32.gmra.mrb[6].mxu0 %vm342_vm0, %v4994_v26 }
 0x10a   : > { %2178 = vmatprep.mubr.f32.mxu0 %v6126_v0 }
 0x10d   : > { %5012 = vmatmul.mubr.msk.f32.vlgmr.msra.gmra.mrb[0].mxu0 %vm342_vm0, %v5006_v29 }
 0x10e   : > { %2184 = vmatprep.mubr.f32.mxu0 %v6126_v0 }
 0x111   : > { %5013 = vmatmul.mubr.msk.f32.gmra.mrb[2].mxu0 %vm342_vm0, %v5007_v30 }
 0x112   : > { %2190 = vmatprep.mubr.f32.mxu0 %v6126_v0 }
 0x115   : > { %5014 = vmatmul.mubr.msk.f32.gmra.mrb[4].mxu0 %vm342_vm0, %v5008_v31 }
 0x116   : > { %2196 = vmatprep.mubr.f32.mxu0 %v6126_v0 }
 0x119   : > { %5015 = vmatmul.mubr.msk.f32.gmra.mrb[6].mxu0 %vm342_vm0, %v5009_v32 }
 0x11a   : > { %2564 = vmatprep.mubr.f32.mxu0 %v6126_v0 }
 0x1b4   : > { %v5320_v44 = vpop.f32.mrb[0].mxu1 }
 0x1b5   : > { %v2329_v45 = vadd.f32 %v5320_v44, %v2312_v41  ;;  %v2269_v47 = vpop.f32.mrb[1].mxu1 }
 0x1b6   : > { %v2326_v48 = vadd.f32 %v2307_v40, %v2269_v47  ;;  %v6616_v47 = vld [vmem:[%s7381_s4 + $0x20] sm:$0xff] }
 0x1b7   : > { %v2341_v50 = vmax.f32 %v2329_v45, 0.0  ;;  %5332 = vmatprep.mubr.msk.f32.mxu1 %vm2487_vm12, %v6616_v47 }
 0x1b8   : > { %v2338_v52 = vmax.f32 %v2326_v48, 0.0  ;;  %v5323_v53 = vpop.f32.mrb[2].mxu1 }
 0x1b9   : > { %v2370_v54 = vmul.f32 %v2361_v46, %v2341_v50  ;;  %v2335_v55 = vadd.f32 %v5323_v53, %v2322_v49  ;;  %v2279_v56 = vpop.f32.mrb[3].mxu1  ;;  %v4625_v53 = vld [vmem:[%s7382_s5] sm:$0xff] }
 0x1ba   : > { %v2367_v57 = vmul.f32 %v2361_v46, %v2338_v52  ;;  %v2332_v58 = vadd.f32 %v2317_v51, %v2279_v56 }
 0x1bb   : > { %2383 = vst.msk [vmem:[#allocation2 + $0x38] sm:$0xff] %vm2379_vm11, %v2370_v54  ;;  %v2347_v59 = vmax.f32 %v2335_v55, 0.0 }
 0x1bc   : > { %2380 = vst.msk [vmem:[#allocation2 + $0x18] sm:$0xff] %vm2379_vm11, %v2367_v57  ;;  %v2344_v60 = vmax.f32 %v2332_v58, 0.0  ;;  %v4627_v57 = vld [vmem:[%s7382_s5 + $0x10] sm:$0xff] }
 0x1bd   : > { %v2376_v61 = vmul.f32 %v2361_v46, %v2347_v59 }
 0x1be   : > { %v2373_v62 = vmul.f32 %v2361_v46, %v2344_v60 }
 0x1bf   : > { %2389 = vst.msk [vmem:[#allocation2 + $0x78] sm:$0xff] %vm2379_vm11, %v2376_v61  ;;  %v4674_v61 = vld [vmem:[%s7384_s7] sm:$0xff] }
 0x1c0   : > { %2386 = vst.msk [vmem:[#allocation2 + $0x58] sm:$0xff] %vm2379_vm11, %v2373_v62  ;;  %v4628_v62 = vld [vmem:[%s7382_s5 + $0x18] sm:$0xff] }
 0x1c2   : > { %v2397_v63 = vld [vmem:[#allocation2 + $0x38] sm:$0xff] }
 0x1c3   : > { %v2393_v1 = vld [vmem:[#allocation2 + $0x18] sm:$0xff] }
 0x1c4   : > { %v6576_v2 = vpack.c.bf16 %v2397_v63, %v2393_v1 }
 0x1c6   : > { %v2405_v3 = vld [vmem:[#allocation2 + $0x78] sm:$0xff] }
 0x1c7   : > { %v2401_v4 = vld [vmem:[#allocation2 + $0x58] sm:$0xff] }
 0x1c8   : > { %v6578_v5 = vpack.c.bf16 %v2405_v3, %v2401_v4 }
 0x1e0   : > { %v2180_v6 = vpop.f32.mrb[0].mxu0 }
 0x1e1   : > { %v2324_v9 = vadd.f32 %v2307_v40, %v2180_v6  ;;  %v2182_v11 = vpop.f32.mrb[1].mxu0 }
 0x1e2   : > { %v2325_v12 = vadd.f32 %v2307_v40, %v2182_v11 }
 0x1e3   : > { %v2336_v14 = vmax.f32 %v2324_v9, 0.0 }
 0x1e4   : > { %v2337_v15 = vmax.f32 %v2325_v12, 0.0  ;;  %v2186_v16 = vpop.f32.mrb[2].mxu0 }
 0x1e5   : > { %v6580_v17 = vmul.f32 %v2353_v10, %v2336_v14  ;;  %v2327_v18 = vadd.f32 %v2312_v41, %v2186_v16  ;;  %v2188_v19 = vpop.f32.mrb[3].mxu0 }
 0x1e6   : > { %v6582_v20 = vmul.f32 %v2357_v13, %v2337_v15  ;;  %v2328_v21 = vadd.f32 %v2312_v41, %v2188_v19 }
 0x1e7   : > { %v2339_v22 = vmax.f32 %v2327_v18, 0.0 }
 0x1e8   : > { %v2340_v23 = vmax.f32 %v2328_v21, 0.0  ;;  %v2192_v24 = vpop.f32.mrb[4].mxu0  ;;  %v6585_v25 = vpack.i.bf16 %v2393_v1, %v6582_v20 }
 0x1e9   : > { %v6587_v26 = vmul.f32 %v2353_v10, %v2339_v22  ;;  %v2330_v27 = vadd.f32 %v2317_v51, %v2192_v24  ;;  %v2194_v28 = vpop.f32.mrb[5].mxu0 }
 0x1ea   : > { %v6589_v29 = vmul.f32 %v2357_v13, %v2340_v23  ;;  %v2331_v30 = vadd.f32 %v2317_v51, %v2194_v28  ;;  %5835 = vrot.lane.b32.xlu1 %v6585_v25, %s6127_s13 }
 0x1eb   : > { %v2342_v31 = vmax.f32 %v2330_v27, 0.0  ;;  %v6595_v32 = vpack.i.bf16 %v6587_v26, %v6580_v17  ;;  %v5527_v33 = vpack.c.bf16 %v6587_v26, %v6580_v17 }
 0x1ec   : > { %v2343_v34 = vmax.f32 %v2331_v30, 0.0  ;;  %v2198_v35 = vpop.f32.mrb[6].mxu0  ;;  %v6600_v36 = vpack.i.bf16 %v2397_v63, %v6589_v29  ;;  %v5525_v37 = vpack.c.bf16 %v6589_v29, %v6582_v20  ;;  %v6957_v20 = vld [vmem:[%s7381_s4 + $0x78] sm:$0xff] }
 0x1ed   : > { %v6604_v38 = vmul.f32 %v2353_v10, %v2342_v31  ;;  %v2333_v39 = vadd.f32 %v2322_v49, %v2198_v35  ;;  %v2200_v40 = vpop.f32.mrb[7].mxu0 }
 0x1ee   : > { %v6606_v41 = vmul.f32 %v2357_v13, %v2343_v34  ;;  %v2334_v42 = vadd.f32 %v2322_v49, %v2200_v40  ;;  %5840 = vrot.lane.b32.xlu0 %v6600_v36, %s6127_s13  ;;  %v6786_v34 = vld [vmem:[%s7381_s4 + $0x30] sm:$0xff] }
 0x1ef   : > { %v2345_v43 = vmax.f32 %v2333_v39, 0.0 }
 0x1f0   : > { %v2346_v44 = vmax.f32 %v2334_v42, 0.0  ;;  %v5844_v45 = vpack.i.bf16 %v2401_v4, %v6606_v41  ;;  %v6799_v42 = vld [vmem:[%s7381_s4 + $0x38] sm:$0xff] }
 0x1f1   : > { %v6611_v46 = vmul.f32 %v2353_v10, %v2345_v43 }
 0x1f2   : > { %v6618_v48 = vmul.f32 %v2357_v13, %v2346_v44  ;;  %5845 = vrot.lane.b32.xlu1 %v5844_v45, %s6127_s13 }
 0x1f3   : > { %v5939_v49 = vpack.i.bf16 %v6611_v46, %v6604_v38  ;;  %v5531_v50 = vpack.c.bf16 %v6611_v46, %v6604_v38 }
 0x1f4   : > { %v5854_v51 = vpack.i.bf16 %v2405_v3, %v6618_v48  ;;  %v5529_v52 = vpack.c.bf16 %v6618_v48, %v6606_v41  ;;  %v5065_v48 = vld [vmem:[%s7381_s4 + $0x80] sm:$0xff] }
 0x1f6   : > { %5850 = vrot.lane.b32.xlu1 %v6585_v25, %s6128_s14  ;;  %5855 = vrot.lane.b32.xlu0 %v5854_v51, %s6127_s13 }
 0x1fa   : > { %5865 = vrot.lane.b32.xlu1 %v5844_v45, %s6128_s14  ;;  %5860 = vrot.lane.b32.xlu0 %v6600_v36, %s6128_s14 }
 0x1fe   : > { %5870 = vrot.lane.b32.xlu1 %v6585_v25, %s6129_s15  ;;  %5875 = vrot.lane.b32.xlu0 %v5854_v51, %s6128_s14 }
 0x202   : > { %5885 = vrot.lane.b32.xlu1 %v5844_v45, %s6129_s15  ;;  %5880 = vrot.lane.b32.xlu0 %v6600_v36, %s6129_s15 }
 0x206   : > { %5890 = vrot.lane.b32.xlu1 %v6585_v25, %s6130_s16  ;;  %5895 = vrot.lane.b32.xlu0 %v5854_v51, %s6129_s15 }
 0x20a   : > { %5905 = vrot.lane.b32.xlu1 %v5844_v45, %s6130_s16  ;;  %5900 = vrot.lane.b32.xlu0 %v6600_v36, %s6130_s16 }
 0x20e   : > { %5915 = vrot.lane.b32.xlu1 %v6585_v25, %s6131_s17  ;;  %5910 = vrot.lane.b32.xlu0 %v5854_v51, %s6130_s16 }
 0x212   : > { %5925 = vrot.lane.b32.xlu1 %v6595_v32, %s6131_s17  ;;  %5920 = vrot.lane.b32.xlu0 %v6600_v36, %s6131_s17 }
 0x216   : > { %5935 = vrot.lane.b32.xlu1 %v5854_v51, %s6131_s17  ;;  %5930 = vrot.lane.b32.xlu0 %v5844_v45, %s6131_s17 }
 0x21a   : > { %5945 = vrot.lane.b32.xlu1 %v6595_v32, %s6127_s13  ;;  %5940 = vrot.lane.b32.xlu0 %v5939_v49, %s6131_s17 }
 0x21e   : > { %5955 = vrot.lane.b32.xlu1 %v6600_v36, %s6132_s18  ;;  %5950 = vrot.lane.b32.xlu0 %v6585_v25, %s6132_s18 }
 0x222   : > { %5965 = vrot.lane.b32.xlu1 %v6595_v32, %s6132_s18  ;;  %5960 = vrot.lane.b32.xlu0 %v6126_v0, %s6127_s13 }
 0x226   : > { %5975 = vrot.lane.b32.xlu1 %v5844_v45, %s6132_s18  ;;  %5970 = vrot.lane.b32.xlu0 %v5939_v49, %s6127_s13 }
 0x22a   : > { %5980 = vrot.lane.b32.xlu1 %v6126_v0, %s6127_s13  ;;  %5985 = vrot.lane.b32.xlu0 %v5854_v51, %s6132_s18 }
 0x22e   : > { %5995 = vrot.lane.b32.xlu1 %v6595_v32, %s6128_s14  ;;  %5990 = vrot.lane.b32.xlu0 %v5939_v49, %s6132_s18 }
 0x232   : > { %6005 = vrot.lane.b32.xlu1 %v5939_v49, %s6128_s14  ;;  %6000 = vrot.lane.b32.xlu0 %v6126_v0, %s6128_s14 }
 0x236   : > { %6015 = vrot.lane.b32.xlu1 %v6585_v25, %s6133_s19  ;;  %6010 = vrot.lane.b32.xlu0 %v6126_v0, %s6128_s14 }
 0x23a   : > { %6025 = vrot.lane.b32.xlu1 %v6595_v32, %s6133_s19  ;;  %6020 = vrot.lane.b32.xlu0 %v6600_v36, %s6133_s19 }
 0x23e   : > { %6040 = vrot.lane.b32.xlu1 %v5854_v51, %s6133_s19  ;;  %6030 = vrot.lane.b32.xlu0 %v5844_v45, %s6133_s19 }
 0x242   : > { %6045 = vrot.lane.b32.xlu1 %v6595_v32, %s6129_s15  ;;  %6035 = vrot.lane.b32.xlu0 %v5939_v49, %s6133_s19 }
 0x246   : > { %6055 = vrot.lane.b32.xlu1 %v5939_v49, %s6129_s15  ;;  %6050 = vrot.lane.b32.xlu0 %v6126_v0, %s6129_s15 }
 0x24a   : > { %6065 = vrot.lane.b32.xlu1 %v6595_v32, %s6130_s16  ;;  %6060 = vrot.lane.b32.xlu0 %v6126_v0, %s6129_s15  ;;  %s5811_s15 = smul.u32 24, %s7417_s28 }
 0x24c   : > { %s305_s18 = scalar_lea.vmem %s7385_s8, %s5811_s15 }
 0x24e   : > { %6075 = vrot.lane.b32.xlu1 %v6600_v36, %s6134_s20  ;;  %6070 = vrot.lane.b32.xlu0 %v6585_v25, %s6134_s20  ;;  %v6771_v25 = vld [vmem:[%s7381_s4 + $0x28] sm:$0xff] }
 0x252   : > { %6085 = vrot.lane.b32.xlu1 %v6595_v32, %s6134_s20  ;;  %6080 = vrot.lane.b32.xlu0 %v6126_v0, %s6130_s16 }
 0x256   : > { %6095 = vrot.lane.b32.xlu1 %v5844_v45, %s6134_s20  ;;  %6090 = vrot.lane.b32.xlu0 %v5939_v49, %s6130_s16 }
 0x25a   : > { %6100 = vrot.lane.b32.xlu1 %v6126_v0, %s6130_s16  ;;  %6105 = vrot.lane.b32.xlu0 %v5854_v51, %s6134_s20  ;;  %v4626_v0 = vld [vmem:[%s7382_s5 + $0x8] sm:$0xff] }
 0x25c   : > { %v6715_v54 = vpop.permute.xlu1 %5835 }
 0x25d   : > { %v5838_v55 = vunpack.i.h.bf16 %v6715_v54  ;;  %v5837_v56 = vunpack.i.l.bf16 %v6715_v54 }
 0x25e   : > { %4631 = vperm.xlu1 %5833, %v4625_v53   ;;  %6110 = vrot.lane.b32.xlu0 %v5939_v49, %s6134_s20  ;;  %v6814_v53 = vld [vmem:[%s7381_s4] sm:$0xff] }
 0x25f   : > { %v2465_v63 = vsel %vm338_vm1, %v5837_v56, %v5838_v55 }
 0x260   : > { %v6726_v58 = vpop.permute.xlu0 %5840 }
 0x261   : > { %v5843_v59 = vunpack.i.h.bf16 %v6726_v58  ;;  %v5842_v60 = vunpack.i.l.bf16 %v6726_v58 }
 0x262   : > { %4641 = vperm.xlu1 %5833, %v4627_v57   ;;  %4636 = vperm.xlu0 %5832, %v4626_v0  }
 0x263   : > { %v2468_v1 = vsel %vm338_vm1, %v5842_v60, %v5843_v59 }
 0x264   : > { %v6742_v3 = vpop.permute.xlu1 %5845  ;;  %v5469_v4 = vpack.c.bf16 %v2468_v1, %v2465_v63 }
 0x265   : > { %v5848_v7 = vunpack.i.h.bf16 %v6742_v3  ;;  %v5847_v8 = vunpack.i.l.bf16 %v6742_v3 }
 0x266   : > { %4677 = vperm.xlu1 %5833, %v4674_v61   ;;  %4646 = vperm.xlu0 %5832, %v4628_v62   ;;  %v6827_v61 = vld [vmem:[%s7381_s4 + $0x8] sm:$0xff] }
 0x267   : > { %5470 = vmatprep.subr.bf16.mxu1 %v5469_v4  ;;  %v2471_v14 = vsel %vm338_vm1, %v5847_v8, %v5848_v7 }
 0x268   : > { %5472 = vmatpush3.bf16.msra.mxu1 %v5469_v4  ;;  %v6746_v6 = vpop.permute.xlu1 %5850  ;;  %v6748_v9 = vpop.permute.xlu0 %5855 }
 0x269   : > { %v5858_v10 = vunpack.i.h.bf16 %v6748_v9  ;;  %v5857_v11 = vunpack.i.l.bf16 %v6748_v9  ;;  %v5853_v12 = vunpack.i.h.bf16 %v6746_v6  ;;  %v7399_v13 = vunpack.i.l.bf16 %v6746_v6 }
 0x26b   : > { %v2474_v15 = vsel %vm338_vm1, %v5857_v11, %v5858_v10  ;;  %v2708_v27 = vsel %vm544_vm3, %v7399_v13, %v5853_v12  ;;  %v6842_v10 = vld [vmem:[%s7381_s4 + $0x10] sm:$0xff] }
 0x26c   : > { %v6760_v16 = vpop.permute.xlu1 %5865  ;;  %v6762_v18 = vpop.permute.xlu0 %5860  ;;  %v5473_v19 = vpack.c.bf16 %v2474_v15, %v2471_v14 }
 0x26d   : > { %v5863_v21 = vunpack.i.h.bf16 %v6762_v18  ;;  %v7396_v22 = vunpack.i.l.bf16 %v6762_v18  ;;  %v5868_v23 = vunpack.i.h.bf16 %v6760_v16  ;;  %v7395_v24 = vunpack.i.l.bf16 %v6760_v16 }
 0x26e   : > { %5474 = vmatprep.subr.bf16.mxu1 %v5473_v19 }
 0x26f   : > { %5476 = vmatpush3.bf16.msra.mxu1 %v5473_v19  ;;  %v2711_v28 = vsel %vm544_vm3, %v7396_v22, %v5863_v21  ;;  %v2714_v43 = vsel %vm544_vm3, %v7395_v24, %v5868_v23  ;;  %v6855_v21 = vld [vmem:[%s7381_s4 + $0x18] sm:$0xff] }
 0x270   : > { %v6779_v30 = vpop.permute.xlu1 %5870  ;;  %v6781_v31 = vpop.permute.xlu0 %5875  ;;  %v5485_v32 = vpack.c.bf16 %v2711_v28, %v2708_v27 }
 0x271   : > { %v5878_v35 = vunpack.i.h.bf16 %v6781_v31  ;;  %v7394_v36 = vunpack.i.l.bf16 %v6781_v31  ;;  %v5873_v39 = vunpack.i.h.bf16 %v6779_v30  ;;  %v7393_v40 = vunpack.i.l.bf16 %v6779_v30 }
 0x272   : > { %5333 = vmatmul.mubr.msk.f32.vlgmr.msra.gmra.mrb[4].mxu1 %vm2487_vm12, %v6771_v25  ;;  %5486 = vmatprep.subr.bf16.mxu1 %v5485_v32 }
 0x273   : > { %5488 = vmatpush3.bf16.msra.mxu1 %v5485_v32  ;;  %5335 = vmatprep.mubr.msk.f32.mxu1 %vm2487_vm12, %v6786_v34  ;;  %v2717_v44 = vsel %vm544_vm3, %v7394_v36, %v5878_v35  ;;  %v2955_v62 = vsel %vm759_vm4, %v7393_v40, %v5873_v39  ;;  %v6870_v39 = vld [vmem:[%s7381_s4 + $0x40] sm:$0xff] }
 0x274   : > { %v6807_v45 = vpop.permute.xlu1 %5885  ;;  %v6809_v49 = vpop.permute.xlu0 %5880  ;;  %v5489_v51 = vpack.c.bf16 %v2717_v44, %v2714_v43 }
 0x275   : > { %v5883_v55 = vunpack.i.h.bf16 %v6809_v49  ;;  %v7392_v57 = vunpack.i.l.bf16 %v6809_v49  ;;  %v5888_v0 = vunpack.i.h.bf16 %v6807_v45  ;;  %v7391_v59 = vunpack.i.l.bf16 %v6807_v45 }
 0x276   : > { %5336 = vmatmul.mubr.msk.f32.gmra.mrb[6].mxu1 %vm2487_vm12, %v6799_v42  ;;  %5490 = vmatprep.subr.bf16.mxu1 %v5489_v51 }
 0x277   : > { %5492 = vmatpush3.bf16.msra.mxu1 %v5489_v51  ;;  %5346 = vmatprep.mubr.msk.f32.mxu1 %vm2487_vm12, %v6814_v53  ;;  %v2958_v63 = vsel %vm759_vm4, %v7392_v57, %v5883_v55  ;;  %v2961_v23 = vsel %vm759_vm4, %v7391_v59, %v5888_v0  ;;  %v6883_v0 = vld [vmem:[%s7381_s4 + $0x48] sm:$0xff] }
 0x278   : > { %v6835_v1 = vpop.permute.xlu1 %5890  ;;  %v6837_v4 = vpop.permute.xlu0 %5895  ;;  %v5501_v7 = vpack.c.bf16 %v2958_v63, %v2955_v62 }
 0x279   : > { %v5898_v12 = vunpack.i.h.bf16 %v6837_v4  ;;  %v7386_v14 = vunpack.i.l.bf16 %v6837_v4  ;;  %v5893_v15 = vunpack.i.h.bf16 %v6835_v1  ;;  %v7388_v19 = vunpack.i.l.bf16 %v6835_v1 }
 0x27a   : > { %5347 = vmatmul.mubr.msk.f32.vlgmr.msra.gmra.mrb[4].mxu1 %vm2487_vm12, %v6827_v61  ;;  %5502 = vmatprep.subr.bf16.mxu1 %v5501_v7 }
 0x27b   : > { %5504 = vmatpush3.bf16.msra.mxu1 %v5501_v7  ;;  %5349 = vmatprep.mubr.msk.f32.mxu1 %vm2487_vm12, %v6842_v10  ;;  %v2964_v27 = vsel %vm759_vm4, %v7386_v14, %v5898_v12  ;;  %v3214_v62 = vsel %vm986_vm5, %v7388_v19, %v5893_v15  ;;  %v6909_v15 = vld [vmem:[%s7381_s4 + $0x58] sm:$0xff]  ;;  %v6924_v19 = vld [vmem:[%s7381_s4 + $0x60] sm:$0xff] }
 0x27c   : > { %v6863_v28 = vpop.permute.xlu1 %5905  ;;  %v6865_v32 = vpop.permute.xlu0 %5900  ;;  %v5505_v35 = vpack.c.bf16 %v2964_v27, %v2961_v23  ;;  %v6898_v27 = vld [vmem:[%s7381_s4 + $0x50] sm:$0xff] }
 0x27d   : > { %v5903_v43 = vunpack.i.h.bf16 %v6865_v32  ;;  %v7387_v44 = vunpack.i.l.bf16 %v6865_v32  ;;  %v5908_v51 = vunpack.i.h.bf16 %v6863_v28  ;;  %v7390_v55 = vunpack.i.l.bf16 %v6863_v28 }
 0x27e   : > { %5350 = vmatmul.mubr.msk.f32.gmra.mrb[6].mxu1 %vm2487_vm12, %v6855_v21  ;;  %5506 = vmatprep.subr.bf16.mxu1 %v5505_v35 }
 0x27f   : > { %5508 = vmatpush3.bf16.msra.mxu1 %v5505_v35  ;;  %5360 = vmatprep.mubr.msk.f32.mxu1 %vm2487_vm12, %v6870_v39  ;;  %v3217_v63 = vsel %vm986_vm5, %v7387_v44, %v5903_v43  ;;  %v3220_v43 = vsel %vm986_vm5, %v7390_v55, %v5908_v51  ;;  %v6933_v51 = vld [vmem:[%s7381_s4 + $0x68] sm:$0xff] }
 0x280   : > { %v6891_v7 = vpop.permute.xlu1 %5915  ;;  %v6893_v12 = vpop.permute.xlu0 %5910  ;;  %v5517_v23 = vpack.c.bf16 %v3217_v63, %v3214_v62 }
 0x281   : > { %v5913_v35 = vunpack.i.h.bf16 %v6893_v12  ;;  %v7389_v14 = vunpack.i.l.bf16 %v6893_v12  ;;  %v7398_v46 = vunpack.i.h.bf16 %v6891_v7 }
 0x282   : > { %5361 = vmatmul.mubr.msk.f32.vlgmr.msra.gmra.mrb[4].mxu1 %vm2487_vm12, %v6883_v0  ;;  %5518 = vmatprep.subr.bf16.mxu1 %v5517_v23 }
 0x283   : > { %5520 = vmatpush3.bf16.msra.mxu1 %v5517_v23  ;;  %5363 = vmatprep.mubr.msk.f32.mxu1 %vm2487_vm12, %v6898_v27  ;;  %v3223_v62 = vsel %vm986_vm5, %v7389_v14, %v5913_v35 }
 0x284   : > { %v6917_v63 = vpop.permute.xlu1 %5925  ;;  %v6919_v44 = vpop.permute.xlu0 %5920  ;;  %v5521_v23 = vpack.c.bf16 %v3223_v62, %v3220_v43  ;;  %v6945_v62 = vld [vmem:[%s7381_s4 + $0x70] sm:$0xff] }
 0x285   : > { %v7397_v17 = vunpack.i.h.bf16 %v6919_v44  ;;  %v5922_v26 = vunpack.i.l.bf16 %v6919_v44  ;;  %v5928_v36 = vunpack.i.h.bf16 %v6917_v63 }
 0x286   : > { %5364 = vmatmul.mubr.msk.f32.gmra.mrb[6].mxu1 %vm2487_vm12, %v6909_v15  ;;  %5522 = vmatprep.subr.bf16.mxu1 %v5521_v23 }
 0x287   : > { %5524 = vmatpush3.bf16.msra.mxu1 %v5521_v23  ;;  %5374 = vmatprep.mubr.msk.f32.mxu1 %vm2487_vm12, %v6924_v19  ;;  %v3669_v58 = vsel %vm1424_vm7, %v5922_v26, %v7397_v17 }
 0x288   : > { %v6935_v35 = vpop.permute.xlu1 %5935  ;;  %v6937_v43 = vpop.permute.xlu0 %5930  ;;  %5526 = vmatprep.subr.bf16.mxu1 %v5525_v37 }
 0x28a   : > { %5375 = vmatmul.mubr.msk.f32.vlgmr.msra.gmra.mrb[4].mxu1 %vm2487_vm12, %v6933_v51 }
 0x28b   : > { %5528 = vmatpush1.bf16.msra.mxu1 %v5527_v33  ;;  %5377 = vmatprep.mubr.msk.f32.mxu1 %vm2487_vm12, %v6945_v62  ;;  %v6971_v33 = vld [vmem:[#allocation2] sm:$0xff] }
 0x28c   : > { %v5946_v29 = vpop.permute.xlu1 %5945  ;;  %v6959_v37 = vpop.permute.xlu0 %5940  ;;  %5530 = vmatprep.subr.bf16.mxu1 %v5529_v52 }
 0x28d   : > { %v5948_v23 = vunpack.i.h.bf16 %v5946_v29  ;;  %v5947_v14 = vunpack.i.l.bf16 %v5946_v29  ;;  %v5943_v3 = vunpack.i.h.bf16 %v6959_v37 }
 0x28e   : > { %5378 = vmatmul.mubr.msk.f32.gmra.mrb[6].mxu1 %vm2487_vm12, %v6957_v20 }
 0x28f   : > { %5532 = vmatpush1.bf16.msra.mxu1 %v5531_v50  ;;  %3515 = vmatprep.mubr.f32.mxu1 %v6971_v33  ;;  %v2464_v41 = vsel %vm338_vm1, %v5947_v14, %v5837_v56  ;;  %v2467_v38 = vsel %vm338_vm1, %v5948_v23, %v5842_v60  ;;  %v5917_v50 = vunpack.i.l.bf16 %v6891_v7  ;;  %v5066_v56 = vld [vmem:[%s7381_s4 + $0x88] sm:$0xff] }
 0x290   : > { %v6980_v52 = vpop.permute.xlu1 %5955  ;;  %v6982_v29 = vpop.permute.xlu0 %5950  ;;  %5534 = vmatprep.subr.bf16.mxu1 %v6576_v2  ;;  %v5461_v54 = vpack.c.bf16 %v2467_v38, %v2464_v41 }
 0x292   : > { %5069 = vmatmul.mubr.msk.f32.vlgmr.msra.gmra.mrb[8].mxu1 %vm2487_vm12, %v5065_v48  ;;  %5462 = vmatprep.subr.bf16.mxu0 %v5461_v54  ;;  %v5067_v54 = vld [vmem:[%s7381_s4 + $0x90] sm:$0xff] }
 0x293   : > { %5536 = vmatpush3.bf16.msra.mxu1 %v6576_v2  ;;  %3521 = vmatprep.mubr.f32.mxu1 %v6971_v33  ;;  %v3667_v2 = vsel %vm1424_vm7, %v5917_v50, %v7398_v46 }
 0x294   : > { %v6999_v60 = vpop.permute.xlu1 %5965  ;;  %v5961_v55 = vpop.permute.xlu0 %5960  ;;  %5538 = vmatprep.subr.bf16.mxu1 %v6578_v5  ;;  %v5541_v59 = vpack.c.bf16 %v3669_v58, %v3667_v2 }
 0x295   : > { %v5963_v41 = vunpack.i.h.bf16 %v5961_v55  ;;  %v5962_v38 = vunpack.i.l.bf16 %v5961_v55  ;;  %v5927_v55 = vunpack.i.l.bf16 %v6917_v63  ;;  %v5932_v63 = vunpack.i.l.bf16 %v6937_v43 }
 0x296   : > { %5070 = vmatmul.mubr.msk.f32.gmra.mrb[10].mxu1 %vm2487_vm12, %v5066_v56 }
 0x297   : > { %v2466_v57 = vsel %vm338_vm1, %v5963_v41, %v5948_v23  ;;  %v2463_v40 = vsel %vm338_vm1, %v5962_v38, %v5947_v14  ;;  %5540 = vmatpush3.bf16.msra.mxu1 %v6578_v5  ;;  %3527 = vmatprep.mubr.f32.mxu1 %v6971_v33  ;;  %v5937_v5 = vunpack.i.l.bf16 %v6935_v35  ;;  %v5933_v41 = vunpack.i.h.bf16 %v6937_v43 }
 0x298   : > { %v5463_v24 = vpack.c.bf16 %v2466_v57, %v2463_v40  ;;  %v7014_v22 = vpop.permute.xlu1 %5975  ;;  %v5971_v17 = vpop.permute.xlu0 %5970  ;;  %5542 = vmatprep.subr.bf16.mxu1 %v5541_v59  ;;  %v3666_v59 = vsel %vm1424_vm7, %v5927_v55, %v5917_v50 }
 0x299   : > { %v5973_v23 = vunpack.i.h.bf16 %v5971_v17  ;;  %v5972_v58 = vunpack.i.l.bf16 %v5971_v17  ;;  %v3668_v17 = vsel %vm1424_vm7, %v5928_v36, %v5922_v26  ;;  %v3671_v36 = vsel %vm1424_vm7, %v5932_v63, %v5933_v41 }
 0x29a   : > { %5464 = vmatpush1.bf16.msra.mxu0 %v5463_v24  ;;  %5071 = vmatmul.mubr.msk.f32.gmra.mrb[12].mxu1 %vm2487_vm12, %v5067_v54  ;;  %v5068_v24 = vld [vmem:[%s7381_s4 + $0x98] sm:$0xff]  ;;  %v7400_v26 = vunpack.i.h.bf16 %v6935_v35 }
 0x29b   : > { %3533 = vmatprep.mubr.f32.mxu1 %v6971_v33  ;;  %v2470_v40 = vsel %vm338_vm1, %v5972_v58, %v5847_v8  ;;  %v2473_v57 = vsel %vm338_vm1, %v5973_v23, %v5857_v11  ;;  %v5942_v8 = vunpack.i.l.bf16 %v6959_v37  ;;  %v5543_v37 = vpack.c.bf16 %v3668_v17, %v3666_v59 }
 0x29c   : > { %v5981_v38 = vpop.permute.xlu1 %5980  ;;  %v7034_v2 = vpop.permute.xlu0 %5985  ;;  %v5465_v46 = vpack.c.bf16 %v2473_v57, %v2470_v40  ;;  %v3673_v50 = vsel %vm1424_vm7, %v5937_v5, %v7400_v26  ;;  %v3672_v57 = vsel %vm1424_vm7, %v5943_v3, %v5937_v5  ;;  %v7402_v59 = vunpack.i.h.bf16 %v6891_v7 }
 0x29d   : > { %v5983_v13 = vunpack.i.h.bf16 %v5981_v38  ;;  %v5982_v9 = vunpack.i.l.bf16 %v5981_v38  ;;  %v7401_v38 = vunpack.i.l.bf16 %v6746_v6  ;;  %v7403_v17 = vunpack.i.h.bf16 %v6919_v44 }
 0x29e   : > { %5466 = vmatprep.subr.bf16.mxu0 %v5465_v46  ;;  %5072 = vmatmul.mubr.msk.f32.gmra.mrb[14].mxu1 %vm2487_vm12, %v5068_v24  ;;  %v5958_v6 = vunpack.i.h.bf16 %v6980_v52  ;;  %v5953_v44 = vunpack.i.h.bf16 %v6982_v29  ;;  %v5952_v7 = vunpack.i.l.bf16 %v6982_v29 }
 0x29f   : > { %v2469_v11 = vsel %vm338_vm1, %v5982_v9, %v5972_v58  ;;  %v2472_v14 = vsel %vm338_vm1, %v5983_v13, %v5973_v23  ;;  %5388 = vmatprep.mubr.msk.f32.mxu1 %vm2487_vm12, %v5065_v48  ;;  %v3670_v58 = vsel %vm1424_vm7, %v5942_v8, %v5932_v63  ;;  %v5545_v48 = vpack.c.bf16 %v3673_v50, %v3671_v36 }
 0x2a0   : > { %v5467_v55 = vpack.c.bf16 %v2472_v14, %v2469_v11  ;;  %v5996_v40 = vpop.permute.xlu1 %5995  ;;  %v7048_v46 = vpop.permute.xlu0 %5990  ;;  %v5549_v5 = vpack.c.bf16 %v7403_v17, %v7402_v59  ;;  %v5547_v3 = vpack.c.bf16 %v3672_v57, %v3670_v58  ;;  %v7404_v9 = vunpack.i.l.bf16 %v6762_v18 }
 0x2a1   : > { %v5998_v13 = vunpack.i.h.bf16 %v5996_v40  ;;  %v5997_v23 = vunpack.i.l.bf16 %v5996_v40  ;;  %v5957_v18 = vunpack.i.l.bf16 %v6980_v52  ;;  %v7405_v40 = vunpack.i.l.bf16 %v6760_v16 }
 0x2a2   : > { %5468 = vmatpush1.bf16.msra.mxu0 %v5467_v55  ;;  %5389 = vmatmul.mubr.msk.f32.vlgmr.msra.gmra.mrb[4].mxu1 %vm2487_vm12, %v5066_v56  ;;  %v7407_v16 = vunpack.i.h.bf16 %v6935_v35  ;;  %v7412_v52 = vunpack.i.l.bf16 %v6835_v1 }
 0x2a3   : > { %5544 = vmatpush1.bf16.msra.mxu1 %v5543_v37  ;;  %5391 = vmatprep.mubr.msk.f32.mxu1 %vm2487_vm12, %v5067_v54  ;;  %v2707_v14 = vsel %vm544_vm3, %v5997_v23, %v7401_v38  ;;  %v2710_v56 = vsel %vm544_vm3, %v5998_v13, %v7404_v9  ;;  %v3916_v35 = vsel %vm1647_vm8, %v5957_v18, %v5958_v6  ;;  %v5968_v9 = vunpack.i.h.bf16 %v6999_v60 }
 0x2a4   : > { %5546 = vmatprep.subr.bf16.mxu1 %v5545_v48  ;;  %v6006_v63 = vpop.permute.xlu1 %6005  ;;  %v6001_v8 = vpop.permute.xlu0 %6000  ;;  %v5477_v50 = vpack.c.bf16 %v2710_v56, %v2707_v14  ;;  %v5553_v59 = vpack.c.bf16 %v7407_v16, %v5933_v41  ;;  %v5967_v56 = vunpack.i.l.bf16 %v6999_v60 }
 0x2a5   : > { %v6008_v11 = vunpack.i.h.bf16 %v6006_v63  ;;  %v6007_v36 = vunpack.i.l.bf16 %v6006_v63  ;;  %v6003_v54 = vunpack.i.h.bf16 %v6001_v8  ;;  %v6002_v26 = vunpack.i.l.bf16 %v6001_v8  ;;  %5025 = vmatmul.mubr.msk.f32.vlgmr.msra.gmra.mrb[8].mxu0 %vm2487_vm12, %v6616_v47  ;;  %v5077_v47 = vld [vmem:[%s7381_s4 + $0xa0] sm:$0xff] }
 0x2a6   : > { %5392 = vmatmul.mubr.msk.f32.gmra.mrb[6].mxu1 %vm2487_vm12, %v5068_v24  ;;  %2570 = vmatprep.mubr.f32.mxu0 %v6971_v33  ;;  %v3913_v60 = vsel %vm1647_vm8, %v5967_v56, %v5952_v7  ;;  %v7410_v56 = vunpack.i.l.bf16 %v6807_v45  ;;  %v5565_v45 = vpack.c.bf16 %v5958_v6, %v5953_v44 }
 0x2a7   : > { %v2709_v37 = vsel %vm544_vm3, %v6003_v54, %v5998_v13  ;;  %v2706_v55 = vsel %vm544_vm3, %v6002_v26, %v5997_v23  ;;  %5548 = vmatpush1.bf16.msra.mxu1 %v5547_v3  ;;  %3762 = vmatprep.mubr.f32.mxu1 %v6971_v33  ;;  %v2713_v57 = vsel %vm544_vm3, %v6007_v36, %v7405_v40  ;;  %v7406_v13 = vunpack.i.l.bf16 %v6781_v31 }
 0x2a8   : > { %v5479_v24 = vpack.c.bf16 %v2709_v37, %v2706_v55  ;;  %5478 = vmatprep.subr.bf16.mxu0 %v5477_v50  ;;  %5550 = vmatprep.subr.bf16.mxu1 %v5549_v5  ;;  %v7081_v58 = vpop.permute.xlu1 %6015  ;;  %v6011_v48 = vpop.permute.xlu0 %6010  ;;  %v3914_v31 = vsel %vm1647_vm8, %v5952_v7, %v5953_v44  ;;  %v3915_v54 = vsel %vm1647_vm8, %v5968_v9, %v5957_v18  ;;  %v5988_v26 = vunpack.i.h.bf16 %v7034_v2  ;;  %v5080_v37 = vld [vmem:[%s7381_s4 + $0xb8] sm:$0xff] }
 0x2a9   : > { %v2716_v23 = vsel %vm544_vm3, %v6008_v11, %v7406_v13  ;;  %v6013_v38 = vunpack.i.h.bf16 %v6011_v48  ;;  %v6012_v14 = vunpack.i.l.bf16 %v6011_v48  ;;  %5026 = vmatmul.mubr.msk.f32.gmra.mrb[10].mxu0 %vm2487_vm12, %v6771_v25  ;;  %v5078_v25 = vld [vmem:[%s7381_s4 + $0xa8] sm:$0xff]  ;;  %v5987_v50 = vunpack.i.l.bf16 %v7034_v2 }
 0x2aa   : > { %5480 = vmatpush1.bf16.msra.mxu0 %v5479_v24  ;;  %5081 = vmatmul.mubr.msk.f32.vlgmr.msra.gmra.mrb[8].mxu1 %vm2487_vm12, %v5077_v47  ;;  %v5481_v17 = vpack.c.bf16 %v2716_v23, %v2713_v57  ;;  %v5977_v55 = vunpack.i.l.bf16 %v7014_v22  ;;  %v5993_v40 = vunpack.i.h.bf16 %v7048_v46  ;;  %v5992_v7 = vunpack.i.l.bf16 %v7048_v46 }
 0x2ab   : > { %v2715_v3 = vsel %vm544_vm3, %v6013_v38, %v6008_v11  ;;  %v2712_v63 = vsel %vm544_vm3, %v6012_v14, %v6007_v36  ;;  %5552 = vmatpush3.bf16.msra.mxu1 %v5549_v5  ;;  %2576 = vmatprep.mubr.f32.mxu0 %v6971_v33  ;;  %v5557_v5 = vpack.c.bf16 %v3916_v35, %v3914_v31  ;;  %v5079_v11 = vld [vmem:[%s7381_s4 + $0xb0] sm:$0xff]  ;;  %v7408_v23 = vunpack.i.l.bf16 %v6779_v30 }
 0x2ac   : > { %v5483_v43 = vpack.c.bf16 %v2715_v3, %v2712_v63  ;;  %5482 = vmatprep.subr.bf16.mxu0 %v5481_v17  ;;  %5554 = vmatprep.subr.bf16.mxu1 %v5553_v59  ;;  %v7105_v41 = vpop.permute.xlu1 %6025  ;;  %v7107_v8 = vpop.permute.xlu0 %6020  ;;  %v5559_v13 = vpack.c.bf16 %v3915_v54, %v3913_v60  ;;  %v7409_v46 = vunpack.i.l.bf16 %v6809_v49  ;;  %v3920_v16 = vsel %vm1647_vm8, %v5987_v50, %v5988_v26 }
 0x2ad   : > { %5027 = vmatmul.mubr.msk.f32.gmra.mrb[12].mxu0 %vm2487_vm12, %v6786_v34  ;;  %3768 = vmatprep.mubr.f32.mxu1 %v6971_v33 }
 0x2ae   : > { %5484 = vmatpush1.bf16.msra.mxu0 %v5483_v43  ;;  %5082 = vmatmul.mubr.msk.f32.gmra.mrb[10].mxu1 %vm2487_vm12, %v5078_v25 }
 0x2af   : > { %5556 = vmatpush3.bf16.msra.mxu1 %v5553_v59  ;;  %2582 = vmatprep.mubr.f32.mxu0 %v6971_v33  ;;  %v3919_v59 = vsel %vm1647_vm8, %v5993_v40, %v5987_v50 }
 0x2b0   : > { %5558 = vmatprep.subr.bf16.mxu1 %v5557_v5  ;;  %v7119_v36 = vpop.permute.xlu1 %6040  ;;  %v7121_v34 = vpop.permute.xlu0 %6030  ;;  %3774 = vmatprep.mubr.f32.mxu1 %v6971_v33 }
 0x2b1   : > { %5028 = vmatmul.mubr.msk.f32.gmra.mrb[14].mxu0 %vm2487_vm12, %v6799_v42  ;;  %v5978_v42 = vunpack.i.h.bf16 %v7014_v22 }
 0x2b2   : > { %5083 = vmatmul.mubr.msk.f32.gmra.mrb[12].mxu1 %vm2487_vm12, %v5079_v11  ;;  %2806 = vmatprep.mubr.f32.mxu0 %v6971_v33 }
 0x2b3   : > { %3780 = vmatprep.mubr.f32.mxu1 %v6971_v33  ;;  %v3918_v30 = vsel %vm1647_vm8, %v5977_v55, %v5978_v42  ;;  %v5569_v1 = vpack.c.bf16 %v5988_v26, %v5978_v42 }
 0x2b4   : > { %v6046_v57 = vpop.permute.xlu1 %6045  ;;  %v7140_v18 = vpop.permute.xlu0 %6035  ;;  %v5561_v43 = vpack.c.bf16 %v3920_v16, %v3918_v30  ;;  %v6018_v16 = vunpack.i.h.bf16 %v7081_v58 }
 0x2b5   : > { %v6048_v24 = vunpack.i.h.bf16 %v6046_v57  ;;  %v6047_v48 = vunpack.i.l.bf16 %v6046_v57  ;;  %5033 = vmatmul.mubr.msk.f32.vlgmr.msra.gmra.mrb[8].mxu0 %vm2487_vm12, %v6814_v53  ;;  %v3917_v53 = vsel %vm1647_vm8, %v5992_v7, %v5977_v55 }
 0x2b6   : > { %5084 = vmatmul.mubr.msk.f32.gmra.mrb[14].mxu1 %vm2487_vm12, %v5080_v37  ;;  %2812 = vmatprep.mubr.f32.mxu0 %v6971_v33  ;;  %v5563_v54 = vpack.c.bf16 %v3919_v59, %v3917_v53  ;;  %v6017_v53 = vunpack.i.l.bf16 %v7081_v58  ;;  %v5090_v59 = vld [vmem:[%s7381_s4 + $0xc8] sm:$0xff] }
 0x2b7   : > { %5402 = vmatprep.mubr.msk.f32.mxu1 %vm2487_vm12, %v5077_v47  ;;  %v2954_v38 = vsel %vm759_vm4, %v6047_v48, %v7408_v23  ;;  %v2957_v14 = vsel %vm759_vm4, %v6048_v24, %v7409_v46  ;;  %v7413_v46 = vunpack.i.l.bf16 %v6865_v32 }
 0x2b8   : > { %v6056_v17 = vpop.permute.xlu1 %6055  ;;  %v6051_v31 = vpop.permute.xlu0 %6050  ;;  %v5493_v3 = vpack.c.bf16 %v2957_v14, %v2954_v38 }
 0x2b9   : > { %v6058_v47 = vunpack.i.h.bf16 %v6056_v17  ;;  %v6057_v63 = vunpack.i.l.bf16 %v6056_v17  ;;  %v6053_v49 = vunpack.i.h.bf16 %v6051_v31  ;;  %v6052_v35 = vunpack.i.l.bf16 %v6051_v31  ;;  %5034 = vmatmul.mubr.msk.f32.gmra.mrb[10].mxu0 %vm2487_vm12, %v6827_v61 }
 0x2ba   : > { %5494 = vmatprep.subr.bf16.mxu0 %v5493_v3  ;;  %5403 = vmatmul.mubr.msk.f32.vlgmr.msra.gmra.mrb[4].mxu1 %vm2487_vm12, %v5078_v25  ;;  %v7411_v25 = vunpack.i.l.bf16 %v6837_v4  ;;  %v4161_v17 = vsel %vm1870_vm9, %v6017_v53, %v6018_v16 }
 0x2bb   : > { %v2956_v5 = vsel %vm759_vm4, %v6053_v49, %v6048_v24  ;;  %v2953_v9 = vsel %vm759_vm4, %v6052_v35, %v6047_v48  ;;  %5560 = vmatpush1.bf16.msra.mxu1 %v5559_v13  ;;  %2818 = vmatprep.mubr.f32.mxu0 %v6971_v33  ;;  %v2960_v60 = vsel %vm759_vm4, %v6057_v63, %v7410_v56  ;;  %v6023_v13 = vunpack.i.h.bf16 %v7107_v8 }
 0x2bc   : > { %v5495_v50 = vpack.c.bf16 %v2956_v5, %v2953_v9  ;;  %5562 = vmatprep.subr.bf16.mxu1 %v5561_v43  ;;  %v6066_v55 = vpop.permute.xlu1 %6065  ;;  %v6061_v61 = vpop.permute.xlu0 %6060  ;;  %5405 = vmatprep.mubr.msk.f32.mxu1 %vm2487_vm12, %v5079_v11  ;;  %v2963_v40 = vsel %vm759_vm4, %v6058_v47, %v7411_v25  ;;  %v6022_v11 = vunpack.i.l.bf16 %v7107_v8  ;;  %v6027_v35 = vunpack.i.l.bf16 %v7105_v41  ;;  %v5102_v8 = vld [vmem:[%s7381_s4 + $0xe8] sm:$0xff] }
 0x2bd   : > { %v6068_v7 = vunpack.i.h.bf16 %v6066_v55  ;;  %v6067_v57 = vunpack.i.l.bf16 %v6066_v55  ;;  %v6063_v24 = vunpack.i.h.bf16 %v6061_v61  ;;  %v6062_v48 = vunpack.i.l.bf16 %v6061_v61  ;;  %5035 = vmatmul.mubr.msk.f32.gmra.mrb[12].mxu0 %vm2487_vm12, %v6842_v10  ;;  %v7189_v10 = vld [vmem:[%s7381_s4 + $0xc0] sm:$0xff] }
 0x2be   : > { %5496 = vmatpush1.bf16.msra.mxu0 %v5495_v50  ;;  %5406 = vmatmul.mubr.msk.f32.gmra.mrb[6].mxu1 %vm2487_vm12, %v5080_v37  ;;  %v5497_v4 = vpack.c.bf16 %v2963_v40, %v2960_v60  ;;  %v4163_v22 = vsel %vm1870_vm9, %v6022_v11, %v6023_v13  ;;  %v6028_v9 = vunpack.i.h.bf16 %v7105_v41  ;;  %v6033_v56 = vunpack.i.h.bf16 %v7121_v34 }
 0x2bf   : > { %v2962_v23 = vsel %vm759_vm4, %v6063_v24, %v6058_v47  ;;  %v2959_v38 = vsel %vm759_vm4, %v6062_v48, %v6057_v63  ;;  %5564 = vmatpush1.bf16.msra.mxu1 %v5563_v54  ;;  %2824 = vmatprep.mubr.f32.mxu0 %v6971_v33  ;;  %v3213_v29 = vsel %vm986_vm5, %v6067_v57, %v7412_v52  ;;  %v6032_v60 = vunpack.i.l.bf16 %v7121_v34  ;;  %v5092_v34 = vld [vmem:[%s7381_s4 + $0xd8] sm:$0xff] }
 0x2c0   : > { %v5499_v6 = vpack.c.bf16 %v2962_v23, %v2959_v38  ;;  %5498 = vmatprep.subr.bf16.mxu0 %v5497_v4  ;;  %5566 = vmatprep.subr.bf16.mxu1 %v5565_v45  ;;  %v7194_v44 = vpop.permute.xlu1 %6075  ;;  %v7196_v37 = vpop.permute.xlu0 %6070  ;;  %v3216_v14 = vsel %vm986_vm5, %v6068_v7, %v7413_v46  ;;  %v5573_v31 = vpack.c.bf16 %v4163_v22, %v4161_v17  ;;  %v6043_v54 = vunpack.i.h.bf16 %v7119_v36  ;;  %v5104_v22 = vld [vmem:[%s7381_s4 + $0xf8] sm:$0xff] }
 0x2c1   : > { %5036 = vmatmul.mubr.msk.f32.gmra.mrb[14].mxu0 %vm2487_vm12, %v6855_v21  ;;  %4009 = vmatprep.mubr.f32.mxu1 %v6971_v33  ;;  %v5509_v32 = vpack.c.bf16 %v3216_v14, %v3213_v29  ;;  %v6042_v50 = vunpack.i.l.bf16 %v7119_v36  ;;  %v7414_v55 = vunpack.i.l.bf16 %v6863_v28  ;;  %v7415_v41 = vunpack.i.l.bf16 %v6893_v12 }
 0x2c2   : > { %5500 = vmatpush1.bf16.msra.mxu0 %v5499_v6  ;;  %5093 = vmatmul.mubr.msk.f32.vlgmr.msra.gmra.mrb[8].mxu1 %vm2487_vm12, %v7189_v10  ;;  %v4160_v36 = vsel %vm1870_vm9, %v6027_v35, %v6017_v53  ;;  %v4162_v28 = vsel %vm1870_vm9, %v6028_v9, %v6022_v11  ;;  %v6038_v12 = vunpack.i.h.bf16 %v7140_v18  ;;  %v6037_v24 = vunpack.i.l.bf16 %v7140_v18  ;;  %v5114_v9 = vld [vmem:[%s7381_s4 + $0x108] sm:$0xff] }
 0x2c3   : > { %5568 = vmatpush3.bf16.msra.mxu1 %v5565_v45  ;;  %3053 = vmatprep.mubr.f32.mxu0 %v6971_v33  ;;  %v4165_v48 = vsel %vm1870_vm9, %v6032_v60, %v6033_v56  ;;  %v5575_v23 = vpack.c.bf16 %v4162_v28, %v4160_v36  ;;  %v6078_v29 = vunpack.i.h.bf16 %v7194_v44  ;;  %v6077_v6 = vunpack.i.l.bf16 %v7194_v44 }
 0x2c4   : > { %5510 = vmatprep.subr.bf16.mxu0 %v5509_v32  ;;  %5570 = vmatprep.subr.bf16.mxu1 %v5569_v1  ;;  %v7221_v21 = vpop.permute.xlu1 %6085  ;;  %v6081_v2 = vpop.permute.xlu0 %6080  ;;  %v4166_v18 = vsel %vm1870_vm9, %v6038_v12, %v6042_v50  ;;  %v4164_v38 = vsel %vm1870_vm9, %v6037_v24, %v6032_v60  ;;  %v6073_v46 = vunpack.i.h.bf16 %v7196_v37  ;;  %v6072_v14 = vunpack.i.l.bf16 %v7196_v37  ;;  %v5116_v60 = vld [vmem:[%s7381_s4 + $0x118] sm:$0xff] }
 0x2c5   : > { %v6083_v26 = vunpack.i.h.bf16 %v6081_v2  ;;  %v6082_v42 = vunpack.i.l.bf16 %v6081_v2  ;;  %5045 = vmatmul.mubr.msk.f32.vlgmr.msra.gmra.mrb[8].mxu0 %vm2487_vm12, %v6870_v39  ;;  %4015 = vmatprep.mubr.f32.mxu1 %v6971_v33  ;;  %v5091_v39 = vld [vmem:[%s7381_s4 + $0xd0] sm:$0xff]  ;;  %v5585_v58 = vpack.c.bf16 %v6043_v54, %v6033_v56  ;;  %v4410_v44 = vsel %vm2093_vm10, %v6077_v6, %v6078_v29 }
 0x2c6   : > { %5094 = vmatmul.mubr.msk.f32.gmra.mrb[10].mxu1 %vm2487_vm12, %v5090_v59  ;;  %3059 = vmatprep.mubr.f32.mxu0 %v6971_v33  ;;  %v6088_v53 = vunpack.i.h.bf16 %v7221_v21  ;;  %v5597_v35 = vpack.c.bf16 %v6078_v29, %v6073_v46  ;;  %v5115_v56 = vld [vmem:[%s7381_s4 + $0x110] sm:$0xff] }
 0x2c7   : > { %v3215_v3 = vsel %vm986_vm5, %v6083_v26, %v6068_v7  ;;  %v3212_v30 = vsel %vm986_vm5, %v6082_v42, %v6067_v57  ;;  %5572 = vmatpush3.bf16.msra.mxu1 %v5569_v1  ;;  %4021 = vmatprep.mubr.f32.mxu1 %v6971_v33 }
 0x2c8   : > { %v5511_v47 = vpack.c.bf16 %v3215_v3, %v3212_v30  ;;  %5574 = vmatprep.subr.bf16.mxu1 %v5573_v31  ;;  %v7236_v63 = vpop.permute.xlu1 %6095  ;;  %v6091_v49 = vpop.permute.xlu0 %6090 }
 0x2c9   : > { %v6093_v43 = vunpack.i.h.bf16 %v6091_v49  ;;  %v6092_v5 = vunpack.i.l.bf16 %v6091_v49  ;;  %5046 = vmatmul.mubr.msk.f32.gmra.mrb[10].mxu0 %vm2487_vm12, %v6883_v0  ;;  %v6098_v2 = vunpack.i.h.bf16 %v7236_v63 }
 0x2ca   : > { %5512 = vmatpush1.bf16.msra.mxu0 %v5511_v47  ;;  %5095 = vmatmul.mubr.msk.f32.gmra.mrb[12].mxu1 %vm2487_vm12, %v5091_v39 }
 0x2cb   : > { %3065 = vmatprep.mubr.f32.mxu0 %v6971_v33  ;;  %4027 = vmatprep.mubr.f32.mxu1 %v6971_v33  ;;  %v3219_v0 = vsel %vm986_vm5, %v6092_v5, %v7414_v55  ;;  %v3222_v61 = vsel %vm986_vm5, %v6093_v43, %v7415_v41 }
 0x2cc   : > { %v6101_v25 = vpop.permute.xlu1 %6100  ;;  %v5513_v40 = vpack.c.bf16 %v3222_v61, %v3219_v0  ;;  %v6106_v37 = vpop.permute.xlu0 %6105 }
 0x2cd   : > { %v6103_v7 = vunpack.i.h.bf16 %v6101_v25  ;;  %v6102_v57 = vunpack.i.l.bf16 %v6101_v25  ;;  %5047 = vmatmul.mubr.msk.f32.gmra.mrb[12].mxu0 %vm2487_vm12, %v6898_v27  ;;  %v4167_v27 = vsel %vm1870_vm9, %v6042_v50, %v6043_v54  ;;  %v6108_v1 = vunpack.i.h.bf16 %v6106_v37 }
 0x2ce   : > { %5514 = vmatprep.subr.bf16.mxu0 %v5513_v40  ;;  %5096 = vmatmul.mubr.msk.f32.gmra.mrb[14].mxu1 %vm2487_vm12, %v5092_v34  ;;  %v5577_v52 = vpack.c.bf16 %v4167_v27, %v4165_v48  ;;  %v6107_v32 = vunpack.i.l.bf16 %v6106_v37 }
 0x2cf   : > { %v3218_v45 = vsel %vm986_vm5, %v6102_v57, %v6092_v5  ;;  %v3221_v4 = vsel %vm986_vm5, %v6103_v7, %v6093_v43  ;;  %3071 = vmatprep.mubr.f32.mxu0 %v6971_v33  ;;  %5416 = vmatprep.mubr.msk.f32.mxu1 %vm2487_vm12, %v7189_v10  ;;  %v5579_v10 = vpack.c.bf16 %v4166_v18, %v4164_v38  ;;  %v5113_v43 = vld [vmem:[%s7381_s4 + $0x100] sm:$0xff] }
 0x2d0   : > { %v5515_v11 = vpack.c.bf16 %v3221_v4, %v3218_v45  ;;  %v4414_v31 = vsel %vm2093_vm10, %v6107_v32, %v6108_v1  ;;  %v5601_v5 = vpack.c.bf16 %v6108_v1, %v6098_v2 }
 0x2d1   : > { %5048 = vmatmul.mubr.msk.f32.gmra.mrb[14].mxu0 %vm2487_vm12, %v6909_v15  ;;  %v5581_v15 = vpack.c.bf16 %v6023_v13, %v6018_v16  ;;  %v4408_v13 = vsel %vm2093_vm10, %v6072_v14, %v6073_v46  ;;  %v5103_v16 = vld [vmem:[%s7381_s4 + $0xf0] sm:$0xff] }
 0x2d2   : > { %5516 = vmatpush1.bf16.msra.mxu0 %v5515_v11  ;;  %5417 = vmatmul.mubr.msk.f32.vlgmr.msra.gmra.mrb[4].mxu1 %vm2487_vm12, %v5090_v59  ;;  %v6111_v59 = vpop.permute.xlu0 %6110 }
 0x2d3   : > { %5576 = vmatpush1.bf16.msra.mxu1 %v5575_v23  ;;  %3312 = vmatprep.mubr.f32.mxu0 %v6971_v33  ;;  %v6113_v42 = vunpack.i.h.bf16 %v6111_v59  ;;  %v6112_v17 = vunpack.i.l.bf16 %v6111_v59 }
 0x2d4   : > { %5578 = vmatprep.subr.bf16.mxu1 %v5577_v52  ;;  %5419 = vmatprep.mubr.msk.f32.mxu1 %vm2487_vm12, %v5091_v39 }
 0x2d5   : > { %5057 = vmatmul.mubr.msk.f32.vlgmr.msra.gmra.mrb[8].mxu0 %vm2487_vm12, %v6924_v19  ;;  %v5101_v19 = vld [vmem:[%s7381_s4 + $0xe0] sm:$0xff]  ;;  %v4413_v47 = vsel %vm2093_vm10, %v6113_v42, %v6107_v32 }
 0x2d6   : > { %5420 = vmatmul.mubr.msk.f32.gmra.mrb[6].mxu1 %vm2487_vm12, %v5092_v34  ;;  %3318 = vmatprep.mubr.f32.mxu0 %v6971_v33 }
 0x2d7   : > { %5580 = vmatpush1.bf16.msra.mxu1 %v5579_v10  ;;  %4256 = vmatprep.mubr.f32.mxu1 %v6971_v33 }
 0x2d8   : > { %5582 = vmatprep.subr.bf16.mxu1 %v5581_v15 }
 0x2d9   : > { %5058 = vmatmul.mubr.msk.f32.gmra.mrb[10].mxu0 %vm2487_vm12, %v6933_v51  ;;  %v5589_v51 = vpack.c.bf16 %v4410_v44, %v4408_v13 }
 0x2da   : > { %5105 = vmatmul.mubr.msk.f32.vlgmr.msra.gmra.mrb[8].mxu1 %vm2487_vm12, %v5101_v19  ;;  %3324 = vmatprep.mubr.f32.mxu0 %v6971_v33 }
 0x2db   : > { %5584 = vmatpush3.bf16.msra.mxu1 %v5581_v15  ;;  %4262 = vmatprep.mubr.f32.mxu1 %v6971_v33 }
 0x2dc   : > { %5586 = vmatprep.subr.bf16.mxu1 %v5585_v58 }
 0x2dd   : > { %5059 = vmatmul.mubr.msk.f32.gmra.mrb[12].mxu0 %vm2487_vm12, %v6945_v62  ;;  %v6087_v62 = vunpack.i.l.bf16 %v7221_v21  ;;  %v4409_v21 = vsel %vm2093_vm10, %v6088_v53, %v6077_v6  ;;  %v4632_v28 = vpop.permute.xlu1 %4631 }
 0x2de   : > { %5106 = vmatmul.mubr.msk.f32.gmra.mrb[10].mxu1 %vm2487_vm12, %v5102_v8  ;;  %3330 = vmatprep.mubr.f32.mxu0 %v6971_v33 }
 0x2df   : > { %5588 = vmatpush3.bf16.msra.mxu1 %v5585_v58  ;;  %4268 = vmatprep.mubr.f32.mxu1 %v6971_v33  ;;  %v4407_v26 = vsel %vm2093_vm10, %v6087_v62, %v6072_v14 }
 0x2e0   : > { %5590 = vmatprep.subr.bf16.mxu1 %v5589_v51  ;;  %v5591_v3 = vpack.c.bf16 %v4409_v21, %v4407_v26 }
 0x2e1   : > { %5060 = vmatmul.mubr.msk.f32.gmra.mrb[14].mxu0 %vm2487_vm12, %v6957_v20  ;;  %v6097_v20 = vunpack.i.l.bf16 %v7236_v63  ;;  %v4637_v4 = vpop.permute.xlu0 %4636  ;;  %v4642_v58 = vpop.permute.xlu1 %4641 }
 0x2e2   : > { %5107 = vmatmul.mubr.msk.f32.gmra.mrb[12].mxu1 %vm2487_vm12, %v5103_v16  ;;  %4747 = vmatprep.mubr.f32.mxu0 %v6971_v33 }
 0x2e3   : > { %4274 = vmatprep.mubr.f32.mxu1 %v6971_v33  ;;  %v4412_v30 = vsel %vm2093_vm10, %v6097_v20, %v6098_v2  ;;  %v4411_v39 = vsel %vm2093_vm10, %v6112_v17, %v6097_v20 }
 0x2e4   : > { %v5593_v63 = vpack.c.bf16 %v4414_v31, %v4412_v30  ;;  %v5595_v49 = vpack.c.bf16 %v4413_v47, %v4411_v39 }
 0x2e6   : > { %5108 = vmatmul.mubr.msk.f32.gmra.mrb[14].mxu1 %vm2487_vm12, %v5104_v22 }
 0x2e7   : > { %5430 = vmatprep.mubr.msk.f32.mxu1 %vm2487_vm12, %v5101_v19 }
 0x2ea   : > { %5431 = vmatmul.mubr.msk.f32.vlgmr.msra.gmra.mrb[4].mxu1 %vm2487_vm12, %v5102_v8 }
 0x2eb   : > { %5592 = vmatpush1.bf16.msra.mxu1 %v5591_v3  ;;  %5433 = vmatprep.mubr.msk.f32.mxu1 %vm2487_vm12, %v5103_v16  ;;  %v4647_v16 = vpop.permute.xlu0 %4646 }
 0x2ec   : > { %5594 = vmatprep.subr.bf16.mxu1 %v5593_v63 }
 0x2ee   : > { %5434 = vmatmul.mubr.msk.f32.gmra.mrb[6].mxu1 %vm2487_vm12, %v5104_v22 }
 0x2ef   : > { %5596 = vmatpush1.bf16.msra.mxu1 %v5595_v49  ;;  %4503 = vmatprep.mubr.f32.mxu1 %v6971_v33 }
 0x2f0   : > { %5598 = vmatprep.subr.bf16.mxu1 %v5597_v35 }
 0x2f2   : > { %5117 = vmatmul.mubr.msk.f32.vlgmr.msra.gmra.mrb[8].mxu1 %vm2487_vm12, %v5113_v43 }
 0x2f3   : > { %5600 = vmatpush3.bf16.msra.mxu1 %v5597_v35  ;;  %4509 = vmatprep.mubr.f32.mxu1 %v6971_v33 }
 0x2f4   : > { %5602 = vmatprep.subr.bf16.mxu1 %v5601_v5 }
 0x2f6   : > { %5118 = vmatmul.mubr.msk.f32.gmra.mrb[10].mxu1 %vm2487_vm12, %v5114_v9 }
 0x2f7   : > { %5604 = vmatpush3.bf16.msra.mxu1 %v5601_v5  ;;  %4515 = vmatprep.mubr.f32.mxu1 %v6971_v33 }
 0x2fa   : > { %5119 = vmatmul.mubr.msk.f32.gmra.mrb[12].mxu1 %vm2487_vm12, %v5115_v56 }
 0x2fb   : > { %4521 = vmatprep.mubr.f32.mxu1 %v6971_v33 }
 0x2fe   : > { %5120 = vmatmul.mubr.msk.f32.gmra.mrb[14].mxu1 %vm2487_vm12, %v5116_v60 }
 0x2ff   : > { %5444 = vmatprep.mubr.msk.f32.mxu1 %vm2487_vm12, %v5113_v43 }
 0x302   : > { %5445 = vmatmul.mubr.msk.f32.vlgmr.msra.gmra.mrb[4].mxu1 %vm2487_vm12, %v5114_v9  ;;  %v4673_v9 = vld [vmem:[%s7383_s6] sm:$0xff] }
 0x303   : > { %5447 = vmatprep.mubr.msk.f32.mxu1 %vm2487_vm12, %v5115_v56 }
 0x306   : > { %5448 = vmatmul.mubr.msk.f32.gmra.mrb[6].mxu1 %vm2487_vm12, %v5116_v60  ;;  %v6136_v60 = vmov 0.0|0.0  }
 0x3a8   : > { %v3314_v54 = vpop.f32.mrb[8].mxu0 }
 0x3a9   : > { %v3316_v50 = vpop.f32.mrb[9].mxu0 }
 0x3ac   : > { %v3320_v55 = vpop.f32.mrb[10].mxu0 }
 0x3ad   : > { %v3322_v0 = vpop.f32.mrb[11].mxu0 }
 0x3b0   : > { %v3326_v41 = vpop.f32.mrb[12].mxu0 }
 0x3b1   : > { %v3328_v61 = vpop.f32.mrb[13].mxu0 }
 0x3b4   : > { %v3332_v34 = vpop.f32.mrb[14].mxu0 }
 0x3b5   : > { %v3334_v25 = vpop.f32.mrb[15].mxu0 }
 0x3c5   : > { %v4505_v40 = vpop.f32.mrb[8].mxu1 }
 0x3c6   : > { %v5619_v36 = vadd.f32 %v4505_v40, %v3314_v54  ;;  %v4507_v7 = vpop.f32.mrb[9].mxu1 }
 0x3c7   : > { %v5620_v57 = vadd.f32 %v4507_v7, %v3316_v50  ;;  %v4678_v50 = vpop.permute.xlu1 %4677 }
 0x3c8   : > { %v4649_v24 = vadd.f32 %v5619_v36, %v4632_v28 }
 0x3c9   : > { %v4511_v12 = vpop.f32.mrb[10].mxu1  ;;  %v4650_v27 = vadd.f32 %v5620_v57, %v4632_v28 }
 0x3ca   : > { %v5621_v48 = vadd.f32 %v4511_v12, %v3320_v55  ;;  %v4513_v45 = vpop.f32.mrb[11].mxu1  ;;  %v4661_v52 = vmax.f32 %v4649_v24, 0.0 }
 0x3cb   : > { %v5622_v11 = vadd.f32 %v4513_v45, %v3322_v0  ;;  %v4662_v6 = vmax.f32 %v4650_v27, 0.0 }
 0x3cc   : > { %v4652_v23 = vadd.f32 %v5621_v48, %v4637_v4 }
 0x3cd   : > { %v4653_v18 = vadd.f32 %v5622_v11, %v4637_v4  ;;  %v4517_v38 = vpop.f32.mrb[12].mxu1 }
 0x3ce   : > { %v4664_v10 = vmax.f32 %v4652_v23, 0.0  ;;  %v5623_v15 = vadd.f32 %v4517_v38, %v3326_v41  ;;  %v4519_v29 = vpop.f32.mrb[13].mxu1 }
 0x3cf   : > { %v4665_v46 = vmax.f32 %v4653_v18, 0.0  ;;  %v5624_v14 = vadd.f32 %v4519_v29, %v3328_v61 }
 0x3d0   : > { %v5607_v19 = vpack.c.bf16 %v4664_v10, %v4661_v52  ;;  %v4655_v44 = vadd.f32 %v5623_v15, %v4642_v58 }
 0x3d1   : > { %v4523_v8 = vpop.f32.mrb[14].mxu1  ;;  %v5605_v13 = vpack.c.bf16 %v4665_v46, %v4662_v6  ;;  %v4656_v53 = vadd.f32 %v5624_v14, %v4642_v58 }
 0x3d2   : > { %v5625_v37 = vadd.f32 %v4523_v8, %v3332_v34  ;;  %v4525_v51 = vpop.f32.mrb[15].mxu1  ;;  %v4667_v22 = vmax.f32 %v4655_v44, 0.0 }
 0x3d3   : > { %v5626_v62 = vadd.f32 %v4525_v51, %v3334_v25  ;;  %5606 = vmatprep.subr.bf16.mxu0 %v5605_v13  ;;  %v4668_v21 = vmax.f32 %v4656_v53, 0.0 }
 0x3d4   : > { %v4658_v1 = vadd.f32 %v5625_v37, %v4647_v16  ;;  %5608 = vmatpush1.bf16.msra.mxu0 %v5607_v19 }
 0x3d5   : > { %v4659_v32 = vadd.f32 %v5626_v62, %v4647_v16  ;;  %v5446_v59 = vpop.f32.mrb[4].mxu1 }
 0x3d6   : > { %v4670_v2 = vmax.f32 %v4658_v1, 0.0  ;;  %v4654_v20 = vadd.f32 %v5446_v59, %v4637_v4  ;;  %v4594_v26 = vpop.f32.mrb[5].mxu1 }
 0x3d7   : > { %v4671_v42 = vmax.f32 %v4659_v32, 0.0  ;;  %v4651_v17 = vadd.f32 %v4632_v28, %v4594_v26 }
 0x3d8   : > { %v5611_v31 = vpack.c.bf16 %v4670_v2, %v4667_v22  ;;  %v4666_v3 = vmax.f32 %v4654_v20, 0.0 }
 0x3d9   : > { %v4663_v30 = vmax.f32 %v4651_v17, 0.0  ;;  %v5449_v39 = vpop.f32.mrb[6].mxu1  ;;  %v5609_v47 = vpack.c.bf16 %v4671_v42, %v4668_v21 }
 0x3da   : > { %v4660_v63 = vadd.f32 %v5449_v39, %v4647_v16  ;;  %v4604_v49 = vpop.f32.mrb[7].mxu1 }
 0x3db   : > { %v5614_v35 = vpack.c.bf16 %v4666_v3, %v4663_v30  ;;  %v4657_v43 = vadd.f32 %v4642_v58, %v4604_v49  ;;  %5610 = vmatprep.subr.bf16.mxu0 %v5609_v47 }
 0x3dc   : > { %v4672_v5 = vmax.f32 %v4660_v63, 0.0  ;;  %5612 = vmatpush1.bf16.msra.mxu0 %v5611_v31 }
 0x3dd   : > { %v4669_v56 = vmax.f32 %v4657_v43, 0.0  ;;  %5613 = vmatprep.subr.bf16.mxu0 %v6136_v60 }
 0x3df   : > { %v5617_v54 = vpack.c.bf16 %v4672_v5, %v4669_v56  ;;  %5125 = vmatmul.mubr.msk.f32.vlgmr.msra.gmra.mrb[16].mxu0 %vm2487_vm12, %v4673_v9 }
 0x3e0   : > { %5615 = vmatpush3.bf16.msra.mxu0 %v5614_v35  ;;  %5458 = vmatprep.mubr.msk.f32.mxu0 %vm6137_vm13, %v6971_v33 }
 0x3e1   : > { %5616 = vmatprep.subr.bf16.mxu0 %v6136_v60 }
 0x3e4   : > { %5618 = vmatpush3.bf16.msra.mxu0 %v5617_v54 }
 0x3e7   : > { %5459 = vmatmul.mubr.msk.f32.vlgmr.msra.gmra.mrb[18].mxu0 %vm2487_vm12, %v4673_v9 }
 0x4b2   : > { %v4749_v55 = vpop.f32.mrb[16].mxu0 }
 0x4b3   : > { %v4750_v0 = vadd.f32 %v4749_v55, %v4678_v50  ;;  %v4751_v41 = vpop.f32.mrb[17].mxu0 }
 0x4b4   : > { %v4752_v61 = vadd.f32 %v4751_v41, %v4678_v50 }
 0x4b5   : > { %4824 = vst [vmem:[%s305_s18] sm:$0xff] %v4750_v0 }
 0x4b6   : > { %4825 = vst [vmem:[%s305_s18 + $0x8] sm:$0xff] %v4752_v61 }
 0x4ba   : > { %v4820_v34 = vpop.f32.mrb[18].mxu0 }
 0x4bb   : > { %v4821_v25 = vadd.f32 %v4820_v34, %v4678_v50  ;;  %v5460_v40 = vpop.f32.mrb[19].mxu0 }
 0x4bd   : > { %4826 = vst.msk [vmem:[%s305_s18 + $0x10] sm:$0xff] %vm2379_vm11, %v4821_v25 }
 0x4be PF: > { %s18_s27 = sadd.s32 1, %s6124_s27  }
 0x4bf   : > { %p15_p4 = scmp.ge.s32.totalorder %s18_s27, 4  }
 0x4c1   :  { %17 = sbr.rel (!%p15_p4) target bundleno = 1 (0x1), region = 98 }

</bundles_post_ra>
